<compile_context>
chip_gen: v5e
topology: v5e:2x2
jax: 0.10.0
libtpu: 0.0.40
codegen_flags: <defaults>
</compile_context>

<pallas_src>
import math
from functools import partial

import jax
import jax.numpy as jnp
from jax.experimental import pallas as pl
from jax.experimental.pallas import tpu as pltpu  # noqa: F401

RMS_EPS = 1e-6
LORA_R = 8

# MXU operand dtype (accumulation is always f32 via preferred_element_type).
MATMUL_DTYPE = jnp.bfloat16


def _mm(a, b):
    """Activation (f32) x pre-cast bf16 weight -> f32 accumulation on the MXU."""
    return jnp.dot(a.astype(MATMUL_DTYPE), b, preferred_element_type=jnp.float32)


def _gelu_tanh(x):
    # NewGELU (tanh approximation), as used by vampnet's GatedGELU.
    return 0.5 * x * (1.0 + jnp.tanh(math.sqrt(2.0 / math.pi)
                                     * (x + 0.044715 * x * x * x)))


# ----------------------------------------------------------------------------
# Fused L-layer TransformerLayer kernel (single invocation, no grid).
# ----------------------------------------------------------------------------
def _transformer_stack_kernel(x_ref, bias_ref, film_ref,
                              n1w_ref, n3w_ref,
                              wqkv_ref, wo_ref, w1_ref, w2_ref,
                              o_ref, *, n_head, n_layers):
    x = x_ref[...]                                   # [B, T, D] f32
    bias = bias_ref[...]                             # [H*B, T, T] f32 (pos bias + key mask)
    B, T, D = x.shape
    H = n_head
    dh = D // H
    BT = B * T

    for l in range(n_layers):                        # static unroll over fused layers
        film = film_ref[l]                           # [B, 4D] f32 (precomputed in wrapper)
        g1 = film[:, 0 * D:1 * D]
        b1 = film[:, 1 * D:2 * D]
        g3 = film[:, 2 * D:3 * D]
        b3 = film[:, 3 * D:4 * D]

        # ---- RMSNorm_1 + FiLM_1 (f32 elementwise) ----
        var = jnp.mean(x * x, axis=-1, keepdims=True)
        y = x * jax.lax.rsqrt(var + RMS_EPS) * n1w_ref[l][None, None, :]
        y = y * (g1[:, None, :] + 1.0) + b1[:, None, :]

        # ---- fused QKV projection: [BT, D] @ [D, 3D], bf16 operands, f32 acc ----
        qkv = _mm(y.reshape(BT, D), wqkv_ref[l])     # [BT, 3D] f32
        # (1/sqrt(dh) already folded into the Q weight columns on the host.)

        def heads(col0):
            # Collect all heads of one of {q, k, v} into a head-major [H*B, T, dh] batch.
            parts = [qkv[:, col0 + h * dh: col0 + (h + 1) * dh].reshape(B, T, dh)
                     for h in range(H)]
            return jnp.concatenate(parts, axis=0)

        q = heads(0)                                 # [H*B, T, dh]
        k = heads(D)
        v = heads(2 * D)

        # ---- attention scores + precombined additive bias (pos bias + key mask) ----
        scores = jnp.einsum('gqd,gkd->gqk',
                            q.astype(MATMUL_DTYPE), k.astype(MATMUL_DTYPE),
                            preferred_element_type=jnp.float32)
        scores = scores + bias                       # single add, no cmp/select

        # ---- stable softmax (f32) ----
        m = jnp.max(scores, axis=-1, keepdims=True)
        p = jnp.exp(scores - m)
        attn = p * pl.reciprocal(jnp.sum(p, axis=-1, keepdims=True), approx=False)

        # ---- context + head concat ----
        ctx = jnp.einsum('gqk,gkd->gqd',
                         attn.astype(MATMUL_DTYPE), v.astype(MATMUL_DTYPE),
                         preferred_element_type=jnp.float32)     # [H*B, T, dh]
        ctx = jnp.concatenate([ctx[h * B:(h + 1) * B] for h in range(H)],
                              axis=-1)               # [B, T, D], head-major columns

        # ---- output projection (full K = D) + residual ----
        x = x + _mm(ctx.reshape(BT, D), wo_ref[l]).reshape(B, T, D)

        # ---- RMSNorm_3 + FiLM_3 ----
        var3 = jnp.mean(x * x, axis=-1, keepdims=True)
        y3 = x * jax.lax.rsqrt(var3 + RMS_EPS) * n3w_ref[l][None, None, :]
        y3 = y3 * (g3[:, None, :] + 1.0) + b3[:, None, :]

        # ---- GEGLU feed-forward + residual (dropout = identity in eval) ----
        h1 = _mm(y3.reshape(BT, D), w1_ref[l])       # [BT, 4D] f32
        gated = h1[:, :2 * D] * _gelu_tanh(h1[:, 2 * D:])        # p1 * gelu(p2)
        x = x + _mm(gated, w2_ref[l]).reshape(B, T, D)

    o_ref[...] = x


def transformer_stack_pallas(sw, x, attn_bias, film_all, n_head):
    B, T, D = x.shape
    L = sw['wqkv_t'].shape[0]
    return pl.pallas_call(
        partial(_transformer_stack_kernel, n_head=n_head, n_layers=L),
        out_shape=jax.ShapeDtypeStruct((B, T, D), jnp.float32),
    )(x, attn_bias, film_all,
      sw['norm1_w'], sw['norm3_w'],
      sw['wqkv_t'], sw['wo_t'], sw['w1_t'], sw['w2_t'])


def _run_stack(stacked_w, x, x_mask, cond, position_bias):
    """Host/XLA-side prep (tiny) + one fused pallas_call over all layers."""
    B, T, D = x.shape
    H = position_bias.shape[0]
    # Additive key mask folded with the relative-position bias (head-major
    # layout matching the kernel's [H*B, T, T] score batch).
    key_bias = (x_mask.astype(jnp.float32) - 1.0) * 1e9                   # [B, T]
    attn_bias = (position_bias[:, None, :, :]
                 + key_bias[None, :, None, :]).reshape(H * B, T, T)
    # FiLM gamma/beta projections for every layer: [L, B, 4D].
    film_all = (jnp.einsum('bc,lcf->lbf', cond, stacked_w['film_w_t'])
                + stacked_w['film_b'][:, None, :])
    return transformer_stack_pallas(stacked_w, x, attn_bias, film_all, H)


@jax.jit
def transformer_layer(stacked_w, x, x_mask, cond, position_bias):
    """Single TransformerLayer (module semantics). x: [B,T,D], x_mask: [B,T]
    (1=keep key, 0=mask), cond: [B,d_cond], position_bias: [H,T,T].
    Returns (x_out, position_bias[h,1,Tq,Tk], None)."""
    x_out = _run_stack(stacked_w, x, x_mask, cond, position_bias)
    return x_out, position_bias[:, None, :, :], None


@jax.jit
def transformer_stack(stacked_w, x, x_mask, cond, position_bias):
    """L fused TransformerLayers in one pallas_call (dispatch amortization)."""
    return _run_stack(stacked_w, x, x_mask, cond, position_bias)


# ----------------------------------------------------------------------------
# Host-side (one-time) helpers: relative-position bias, param init, layout prep.
# ----------------------------------------------------------------------------
def compute_position_bias(emb, t_q, t_kv, num_buckets=32, max_distance=128,
                          bidirectional=True):
    ctx = jnp.arange(t_q, dtype=jnp.int32)[:, None]
    mem = jnp.arange(t_kv, dtype=jnp.int32)[None, :]
    rel = mem - ctx
    nb = num_buckets
    rb = jnp.zeros_like(rel)
    if bidirectional:
        nb = nb // 2
        rb = rb + (rel > 0).astype(jnp.int32) * nb
        rel = jnp.abs(rel)
    else:
        rel = -jnp.minimum(rel, 0)
    max_exact = nb // 2
    is_small = rel < max_exact
    rel_f = jnp.maximum(rel.astype(jnp.float32), 1.0)      # guard log(0); unused branch
    rel_large = max_exact + (jnp.log(rel_f / max_exact)
                             / math.log(max_distance / max_exact)
                             * (nb - max_exact)).astype(jnp.int32)
    rel_large = jnp.minimum(rel_large, nb - 1)
    rb = rb + jnp.where(is_small, rel, rel_large)
    values = emb[rb]                                        # [T_q, T_kv, H]
    return jnp.transpose(values, (2, 0, 1))                 # [H, T_q, T_kv]


def init_params(key, d_model, d_cond, n_head, num_buckets=32, scale=0.02):
    ks = jax.random.split(key, 12)

    def lora_w(k, out_f, in_f, r=LORA_R, alpha=1.0):
        k1, k2, k3 = jax.random.split(k, 3)
        w = jax.random.normal(k1, (out_f, in_f), jnp.float32) * scale
        a = jax.random.normal(k2, (r, in_f), jnp.float32) * scale
        b = jax.random.normal(k3, (out_f, r), jnp.float32) * scale
        return w + (alpha / r) * (b @ a)                    # folded LoRA weight

    D, C = d_model, d_cond
    return dict(
        norm1_w=jnp.ones((D,), jnp.float32),
        norm3_w=jnp.ones((D,), jnp.float32),
        film1_gamma_w=jax.random.normal(ks[0], (D, C), jnp.float32) * scale,
        film1_gamma_b=jnp.zeros((D,), jnp.float32),
        film1_beta_w=jax.random.normal(ks[1], (D, C), jnp.float32) * scale,
        film1_beta_b=jnp.zeros((D,), jnp.float32),
        film3_gamma_w=jax.random.normal(ks[2], (D, C), jnp.float32) * scale,
        film3_gamma_b=jnp.zeros((D,), jnp.float32),
        film3_beta_w=jax.random.normal(ks[3], (D, C), jnp.float32) * scale,
        film3_beta_b=jnp.zeros((D,), jnp.float32),
        wq=lora_w(ks[4], D, D),                             # torch [out, in]
        wk=jax.random.normal(ks[5], (D, D), jnp.float32) * scale,
        wv=lora_w(ks[6], D, D),
        wfc=lora_w(ks[7], D, D),
        rel_bias_emb=jax.random.normal(ks[8], (num_buckets, n_head), jnp.float32) * scale,
        w1=lora_w(ks[9], 4 * D, D),                         # d -> 4d
        w2=lora_w(ks[10], D, 2 * D),                        # 2d -> d (geglu factor 2)
    )


def prepare_layer_weights(p, n_head):
    """One-time host-side layout prep: fuse QKV / FiLM projections, pre-transpose
    every weight to [in, out], fold the 1/sqrt(dh) softmax scale into Wq, and
    cast all MXU weights to bf16 once (no per-call casts in the kernel)."""
    D = p['norm1_w'].shape[0]
    dh = D // n_head
    wq_scaled = p['wq'] * (1.0 / math.sqrt(dh))
    return dict(
        norm1_w=p['norm1_w'].astype(jnp.float32),
        norm3_w=p['norm3_w'].astype(jnp.float32),
        film_w_t=jnp.concatenate([p['film1_gamma_w'].T, p['film1_beta_w'].T,
                                  p['film3_gamma_w'].T, p['film3_beta_w'].T],
                                 axis=1).astype(jnp.float32),     # [C, 4D]
        film_b=jnp.concatenate([p['film1_gamma_b'], p['film1_beta_b'],
                                p['film3_gamma_b'], p['film3_beta_b']]
                               ).astype(jnp.float32),             # [4D]
        wqkv_t=jnp.concatenate([wq_scaled.T, p['wk'].T, p['wv'].T],
                               axis=1).astype(MATMUL_DTYPE),      # [D, 3D]
        wo_t=p['wfc'].T.astype(MATMUL_DTYPE),                     # [D, D]
        w1_t=p['w1'].T.astype(MATMUL_DTYPE),                      # [D, 4D]
        w2_t=p['w2'].T.astype(MATMUL_DTYPE),                      # [2D, D]
    )


def stack_layer_weights(layer_list):
    """Stack per-layer prepared weights along a leading L axis."""
    return {k: jnp.stack([lw[k] for lw in layer_list], axis=0)
            for k in layer_list[0]}


# ----------------------------------------------------------------------------
# Pure-JAX f32 reference (mirrors the PyTorch module, eval mode, LoRA folded).
# ----------------------------------------------------------------------------
def _reference_layer(p, x, x_mask, cond, pos_bias, n_head):
    B, T, D = x.shape
    dh = D // n_head

    def rms(v, w):
        var = jnp.mean(v * v, axis=-1, keepdims=True)
        return v * jax.lax.rsqrt(var + RMS_EPS) * w

    def film(v, gw, gb, bw, bb):
        g = cond @ gw.T + gb
        b = cond @ bw.T + bb
        return v * (g[:, None, :] + 1.0) + b[:, None, :]

    y = film(rms(x, p['norm1_w']),
             p['film1_gamma_w'], p['film1_gamma_b'],
             p['film1_beta_w'], p['film1_beta_b'])
    q = (y @ p['wq'].T).reshape(B, T, n_head, dh).transpose(0, 2, 1, 3)
    k = (y @ p['wk'].T).reshape(B, T, n_head, dh).transpose(0, 2, 1, 3)
    v = (y @ p['wv'].T).reshape(B, T, n_head, dh).transpose(0, 2, 1, 3)
    attn = jnp.einsum('bhqd,bhkd->bhqk', q, k) / math.sqrt(dh)
    attn = attn + pos_bias[None, :, :, :]
    attn = jnp.where(x_mask[:, None, None, :] == 0, -1e9, attn)
    attn = jax.nn.softmax(attn, axis=-1)
    out = jnp.einsum('bhqk,bhkd->bhqd', attn, v)
    out = out.transpose(0, 2, 1, 3).reshape(B, T, D) @ p['wfc'].T
    x = x + out
    y = film(rms(x, p['norm3_w']),
             p['film3_gamma_w'], p['film3_gamma_b'],
             p['film3_beta_w'], p['film3_beta_b'])
    h = y @ p['w1'].T
    y = (h[..., :2 * D] * _gelu_tanh(h[..., 2 * D:])) @ p['w2'].T
    return x + y


if __name__ == "__main__":
    B, T, D, H, C = 2, 16, 128, 4, 16
    key = jax.random.PRNGKey(0)
    kp, kx, kc = jax.random.split(key, 3)

    params = init_params(kp, d_model=D, d_cond=C, n_head=H)
    layer_w = prepare_layer_weights(params, H)
    w_single = stack_layer_weights([layer_w])                     # L = 1
    # Relative-position bias precomputed ONCE outside the jitted per-token path.
    pos_bias = compute_position_bias(params['rel_bias_emb'], T, T)  # [H, T, T]

    x = jax.random.normal(kx, (B, T, D), jnp.float32)
    cond = jax.random.normal(kc, (B, C), jnp.float32)
    x_mask = jnp.ones((B, T), jnp.float32).at[1, T - 3:].set(0.0)

    # --- single layer (module semantics) ---
    out, pb, xattn_bias = transformer_layer(w_single, x, x_mask, cond, pos_bias)
    jax.block_until_ready(out)
    assert out.shape == (B, T, D)
    assert pb.shape == (H, 1, T, T)
    assert xattn_bias is None

    # Validate against the pure-JAX f32 reference (bf16 MXU operand tolerance).
    ref = _reference_layer(params, x, x_mask, cond, pos_bias, H)
    max_err = float(jnp.max(jnp.abs(out - ref)))
    assert max_err < 7.5e-2, f"kernel/reference mismatch: {max_err}"

    # --- 4 fused layers in ONE pallas_call (dispatch-overhead amortization) ---
    layer_keys = jax.random.split(jax.random.PRNGKey(1), 4)
    w_stack = stack_layer_weights(
        [prepare_layer_weights(init_params(k, D, C, H), H) for k in layer_keys])
    out4 = transformer_stack(w_stack, x, x_mask, cond, pos_bias)
    jax.block_until_ready(out4)
    assert out4.shape == (B, T, D)

    # TODO(synk): dropout layers are identity (eval-mode forward); training-mode
    # dropout RNG is not implemented.
    print("KERNEL_OK")
</pallas_src>

<mosaic_0001>
module attributes {stable_mosaic.version = 11 : i64} {
  func.func @_transformer_stack_kernel(%arg0: memref<2x16x128xf32, #tpu.memory_space<vmem>>, %arg1: memref<8x16x16xf32, #tpu.memory_space<vmem>>, %arg2: memref<1x2x512xf32, #tpu.memory_space<vmem>>, %arg3: memref<1x128xf32, #tpu.memory_space<vmem>>, %arg4: memref<1x128xf32, #tpu.memory_space<vmem>>, %arg5: memref<1x128x384xbf16, #tpu.memory_space<vmem>>, %arg6: memref<1x128x128xbf16, #tpu.memory_space<vmem>>, %arg7: memref<1x128x512xbf16, #tpu.memory_space<vmem>>, %arg8: memref<1x256x128xbf16, #tpu.memory_space<vmem>>, %arg9: memref<2x16x128xf32, #tpu.memory_space<vmem>>) attributes {dimension_semantics = [], scalar_prefetch = 0 : i64, scratch_operands = 0 : i64, tpu.core_type = #tpu.core_type<tc>} {
    %c0 = arith.constant 0 : index
    %c0_0 = arith.constant 0 : index
    %c0_1 = arith.constant 0 : index
    %0 = vector.load %arg0[%c0, %c0_0, %c0_1] : memref<2x16x128xf32, #tpu.memory_space<vmem>>, vector<2x16x128xf32>
    %c0_2 = arith.constant 0 : index
    %c0_3 = arith.constant 0 : index
    %c0_4 = arith.constant 0 : index
    %1 = vector.load %arg1[%c0_2, %c0_3, %c0_4] : memref<8x16x16xf32, #tpu.memory_space<vmem>>, vector<8x16x16xf32>
    %c0_5 = arith.constant 0 : index
    %c0_6 = arith.constant 0 : index
    %c0_7 = arith.constant 0 : index
    %2 = vector.load %arg2[%c0_5, %c0_6, %c0_7] : memref<1x2x512xf32, #tpu.memory_space<vmem>>, vector<1x2x512xf32>
    %3 = vector.shape_cast %2 : vector<1x2x512xf32> to vector<2x512xf32>
    %4 = vector.extract_strided_slice %3 {offsets = [0, 0], sizes = [2, 128], strides = [1, 1]} : vector<2x512xf32> to vector<2x128xf32>
    %5 = vector.extract_strided_slice %3 {offsets = [0, 128], sizes = [2, 128], strides = [1, 1]} : vector<2x512xf32> to vector<2x128xf32>
    %6 = vector.extract_strided_slice %3 {offsets = [0, 256], sizes = [2, 128], strides = [1, 1]} : vector<2x512xf32> to vector<2x128xf32>
    %7 = vector.extract_strided_slice %3 {offsets = [0, 384], sizes = [2, 128], strides = [1, 1]} : vector<2x512xf32> to vector<2x128xf32>
    %8 = arith.mulf %0, %0 : vector<2x16x128xf32>
    %cst = arith.constant dense<0.000000e+00> : vector<2x16xf32>
    %9 = vector.multi_reduction <add>, %8, %cst [2] : vector<2x16x128xf32> to vector<2x16xf32>
    %10 = vector.shape_cast %9 : vector<2x16xf32> to vector<2x16x1xf32>
    %cst_8 = arith.constant 1.280000e+02 : f32
    %11 = vector.broadcast %cst_8 : f32 to vector<2x16x1xf32>
    %12 = arith.divf %10, %11 : vector<2x16x1xf32>
    %cst_9 = arith.constant 9.99999997E-7 : f32
    %13 = vector.broadcast %cst_9 : f32 to vector<2x16x1xf32>
    %14 = arith.addf %12, %13 : vector<2x16x1xf32>
    %15 = math.rsqrt %14 : vector<2x16x1xf32>
    %16 = vector.broadcast %15 : vector<2x16x1xf32> to vector<2x16x128xf32>
    %17 = arith.mulf %0, %16 : vector<2x16x128xf32>
    %c0_10 = arith.constant 0 : index
    %c0_11 = arith.constant 0 : index
    %18 = vector.load %arg3[%c0_10, %c0_11] : memref<1x128xf32, #tpu.memory_space<vmem>>, vector<1x128xf32>
    %19 = vector.shape_cast %18 : vector<1x128xf32> to vector<128xf32>
    %20 = vector.shape_cast %19 : vector<128xf32> to vector<1x1x128xf32>
    %21 = vector.broadcast %20 : vector<1x1x128xf32> to vector<2x16x128xf32>
    %22 = arith.mulf %17, %21 : vector<2x16x128xf32>
    %23 = vector.shape_cast %4 : vector<2x128xf32> to vector<2x1x128xf32>
    %cst_12 = arith.constant 1.000000e+00 : f32
    %24 = vector.broadcast %cst_12 : f32 to vector<2x1x128xf32>
    %25 = arith.addf %23, %24 : vector<2x1x128xf32>
    %26 = vector.broadcast %25 : vector<2x1x128xf32> to vector<2x16x128xf32>
    %27 = arith.mulf %22, %26 : vector<2x16x128xf32>
    %28 = vector.shape_cast %5 : vector<2x128xf32> to vector<2x1x128xf32>
    %29 = vector.broadcast %28 : vector<2x1x128xf32> to vector<2x16x128xf32>
    %30 = arith.addf %27, %29 : vector<2x16x128xf32>
    %31 = vector.shape_cast %30 : vector<2x16x128xf32> to vector<32x128xf32>
    %c0_13 = arith.constant 0 : index
    %c0_14 = arith.constant 0 : index
    %c0_15 = arith.constant 0 : index
    %32 = vector.load %arg5[%c0_13, %c0_14, %c0_15] : memref<1x128x384xbf16, #tpu.memory_space<vmem>>, vector<1x128x384xbf16>
    %33 = vector.shape_cast %32 : vector<1x128x384xbf16> to vector<128x384xbf16>
    %34 = arith.truncf %31 : vector<32x128xf32> to vector<32x128xbf16>
    %cst_16 = arith.constant dense<0.000000e+00> : vector<32x384xf32>
    %35 = tpu.matmul %34, %33, %cst_16 {dimension_numbers = #tpu.dot_dimension_numbers<[1], [0], [0], [1], [0, 0, 1, 1], [], []>} : vector<32x128xbf16>, vector<128x384xbf16>, vector<32x384xf32> -> vector<32x384xf32>
    %36 = vector.extract_strided_slice %35 {offsets = [0, 0], sizes = [32, 32], strides = [1, 1]} : vector<32x384xf32> to vector<32x32xf32>
    %37 = vector.shape_cast %36 : vector<32x32xf32> to vector<2x16x32xf32>
    %38 = vector.extract_strided_slice %35 {offsets = [0, 32], sizes = [32, 32], strides = [1, 1]} : vector<32x384xf32> to vector<32x32xf32>
    %39 = vector.shape_cast %38 : vector<32x32xf32> to vector<2x16x32xf32>
    %40 = vector.extract_strided_slice %35 {offsets = [0, 64], sizes = [32, 32], strides = [1, 1]} : vector<32x384xf32> to vector<32x32xf32>
    %41 = vector.shape_cast %40 : vector<32x32xf32> to vector<2x16x32xf32>
    %42 = vector.extract_strided_slice %35 {offsets = [0, 96], sizes = [32, 32], strides = [1, 1]} : vector<32x384xf32> to vector<32x32xf32>
    %43 = vector.shape_cast %42 : vector<32x32xf32> to vector<2x16x32xf32>
    %44 = tpu.concatenate %37, %39, %41, %43 in 0 : vector<2x16x32xf32>, vector<2x16x32xf32>, vector<2x16x32xf32>, vector<2x16x32xf32> -> vector<8x16x32xf32>
    %45 = vector.extract_strided_slice %35 {offsets = [0, 128], sizes = [32, 32], strides = [1, 1]} : vector<32x384xf32> to vector<32x32xf32>
    %46 = vector.shape_cast %45 : vector<32x32xf32> to vector<2x16x32xf32>
    %47 = vector.extract_strided_slice %35 {offsets = [0, 160], sizes = [32, 32], strides = [1, 1]} : vector<32x384xf32> to vector<32x32xf32>
    %48 = vector.shape_cast %47 : vector<32x32xf32> to vector<2x16x32xf32>
    %49 = vector.extract_strided_slice %35 {offsets = [0, 192], sizes = [32, 32], strides = [1, 1]} : vector<32x384xf32> to vector<32x32xf32>
    %50 = vector.shape_cast %49 : vector<32x32xf32> to vector<2x16x32xf32>
    %51 = vector.extract_strided_slice %35 {offsets = [0, 224], sizes = [32, 32], strides = [1, 1]} : vector<32x384xf32> to vector<32x32xf32>
    %52 = vector.shape_cast %51 : vector<32x32xf32> to vector<2x16x32xf32>
    %53 = tpu.concatenate %46, %48, %50, %52 in 0 : vector<2x16x32xf32>, vector<2x16x32xf32>, vector<2x16x32xf32>, vector<2x16x32xf32> -> vector<8x16x32xf32>
    %54 = vector.extract_strided_slice %35 {offsets = [0, 256], sizes = [32, 32], strides = [1, 1]} : vector<32x384xf32> to vector<32x32xf32>
    %55 = vector.shape_cast %54 : vector<32x32xf32> to vector<2x16x32xf32>
    %56 = vector.extract_strided_slice %35 {offsets = [0, 288], sizes = [32, 32], strides = [1, 1]} : vector<32x384xf32> to vector<32x32xf32>
    %57 = vector.shape_cast %56 : vector<32x32xf32> to vector<2x16x32xf32>
    %58 = vector.extract_strided_slice %35 {offsets = [0, 320], sizes = [32, 32], strides = [1, 1]} : vector<32x384xf32> to vector<32x32xf32>
    %59 = vector.shape_cast %58 : vector<32x32xf32> to vector<2x16x32xf32>
    %60 = vector.extract_strided_slice %35 {offsets = [0, 352], sizes = [32, 32], strides = [1, 1]} : vector<32x384xf32> to vector<32x32xf32>
    %61 = vector.shape_cast %60 : vector<32x32xf32> to vector<2x16x32xf32>
    %62 = tpu.concatenate %55, %57, %59, %61 in 0 : vector<2x16x32xf32>, vector<2x16x32xf32>, vector<2x16x32xf32>, vector<2x16x32xf32> -> vector<8x16x32xf32>
    %63 = arith.truncf %44 : vector<8x16x32xf32> to vector<8x16x32xbf16>
    %64 = arith.truncf %53 : vector<8x16x32xf32> to vector<8x16x32xbf16>
    "tpu.trace_start"() <{level = 10 : i32, message = "gqd,gkd->gqk"}> : () -> ()
    %cst_17 = arith.constant dense<0.000000e+00> : vector<8x16x16xf32>
    %65 = tpu.matmul %63, %64, %cst_17 {dimension_numbers = #tpu.dot_dimension_numbers<[2], [2], [1], [1], [0, 0, 0, 1, 1, 1], [0], [0]>} : vector<8x16x32xbf16>, vector<8x16x32xbf16>, vector<8x16x16xf32> -> vector<8x16x16xf32>
    "tpu.trace_stop"() : () -> ()
    %66 = arith.addf %65, %1 : vector<8x16x16xf32>
    %cst_18 = arith.constant dense<0xFF800000> : vector<8x16xf32>
    %67 = vector.multi_reduction <maximumf>, %66, %cst_18 [2] : vector<8x16x16xf32> to vector<8x16xf32>
    %68 = vector.shape_cast %67 : vector<8x16xf32> to vector<8x16x1xf32>
    %69 = vector.broadcast %68 : vector<8x16x1xf32> to vector<8x16x16xf32>
    %70 = arith.subf %66, %69 : vector<8x16x16xf32>
    %71 = math.exp %70 : vector<8x16x16xf32>
    %cst_19 = arith.constant dense<0.000000e+00> : vector<8x16xf32>
    %72 = vector.multi_reduction <add>, %71, %cst_19 [2] : vector<8x16x16xf32> to vector<8x16xf32>
    %73 = vector.shape_cast %72 : vector<8x16xf32> to vector<8x16x1xf32>
    %74 = tpu.reciprocal %73 : vector<8x16x1xf32> -> vector<8x16x1xf32>
    %75 = vector.broadcast %74 : vector<8x16x1xf32> to vector<8x16x16xf32>
    %76 = arith.mulf %71, %75 : vector<8x16x16xf32>
    %77 = arith.truncf %76 : vector<8x16x16xf32> to vector<8x16x16xbf16>
    %78 = arith.truncf %62 : vector<8x16x32xf32> to vector<8x16x32xbf16>
    "tpu.trace_start"() <{level = 10 : i32, message = "gqk,gkd->gqd"}> : () -> ()
    %cst_20 = arith.constant dense<0.000000e+00> : vector<8x16x32xf32>
    %79 = tpu.matmul %77, %78, %cst_20 {dimension_numbers = #tpu.dot_dimension_numbers<[2], [1], [1], [2], [0, 0, 0, 1, 1, 2], [0], [0]>} : vector<8x16x16xbf16>, vector<8x16x32xbf16>, vector<8x16x32xf32> -> vector<8x16x32xf32>
    "tpu.trace_stop"() : () -> ()
    %80 = vector.extract_strided_slice %79 {offsets = [0, 0, 0], sizes = [2, 16, 32], strides = [1, 1, 1]} : vector<8x16x32xf32> to vector<2x16x32xf32>
    %81 = vector.extract_strided_slice %79 {offsets = [2, 0, 0], sizes = [2, 16, 32], strides = [1, 1, 1]} : vector<8x16x32xf32> to vector<2x16x32xf32>
    %82 = vector.extract_strided_slice %79 {offsets = [4, 0, 0], sizes = [2, 16, 32], strides = [1, 1, 1]} : vector<8x16x32xf32> to vector<2x16x32xf32>
    %83 = vector.extract_strided_slice %79 {offsets = [6, 0, 0], sizes = [2, 16, 32], strides = [1, 1, 1]} : vector<8x16x32xf32> to vector<2x16x32xf32>
    %84 = tpu.concatenate %80, %81, %82, %83 in 2 : vector<2x16x32xf32>, vector<2x16x32xf32>, vector<2x16x32xf32>, vector<2x16x32xf32> -> vector<2x16x128xf32>
    %85 = vector.shape_cast %84 : vector<2x16x128xf32> to vector<32x128xf32>
    %c0_21 = arith.constant 0 : index
    %c0_22 = arith.constant 0 : index
    %c0_23 = arith.constant 0 : index
    %86 = vector.load %arg6[%c0_21, %c0_22, %c0_23] : memref<1x128x128xbf16, #tpu.memory_space<vmem>>, vector<1x128x128xbf16>
    %87 = vector.shape_cast %86 : vector<1x128x128xbf16> to vector<128x128xbf16>
    %88 = arith.truncf %85 : vector<32x128xf32> to vector<32x128xbf16>
    %cst_24 = arith.constant dense<0.000000e+00> : vector<32x128xf32>
    %89 = tpu.matmul %88, %87, %cst_24 {dimension_numbers = #tpu.dot_dimension_numbers<[1], [0], [0], [1], [0, 0, 1, 1], [], []>} : vector<32x128xbf16>, vector<128x128xbf16>, vector<32x128xf32> -> vector<32x128xf32>
    %90 = vector.shape_cast %89 : vector<32x128xf32> to vector<2x16x128xf32>
    %91 = arith.addf %0, %90 : vector<2x16x128xf32>
    %92 = arith.mulf %91, %91 : vector<2x16x128xf32>
    %cst_25 = arith.constant dense<0.000000e+00> : vector<2x16xf32>
    %93 = vector.multi_reduction <add>, %92, %cst_25 [2] : vector<2x16x128xf32> to vector<2x16xf32>
    %94 = vector.shape_cast %93 : vector<2x16xf32> to vector<2x16x1xf32>
    %cst_26 = arith.constant 1.280000e+02 : f32
    %95 = vector.broadcast %cst_26 : f32 to vector<2x16x1xf32>
    %96 = arith.divf %94, %95 : vector<2x16x1xf32>
    %cst_27 = arith.constant 9.99999997E-7 : f32
    %97 = vector.broadcast %cst_27 : f32 to vector<2x16x1xf32>
    %98 = arith.addf %96, %97 : vector<2x16x1xf32>
    %99 = math.rsqrt %98 : vector<2x16x1xf32>
    %100 = vector.broadcast %99 : vector<2x16x1xf32> to vector<2x16x128xf32>
    %101 = arith.mulf %91, %100 : vector<2x16x128xf32>
    %c0_28 = arith.constant 0 : index
    %c0_29 = arith.constant 0 : index
    %102 = vector.load %arg4[%c0_28, %c0_29] : memref<1x128xf32, #tpu.memory_space<vmem>>, vector<1x128xf32>
    %103 = vector.shape_cast %102 : vector<1x128xf32> to vector<128xf32>
    %104 = vector.shape_cast %103 : vector<128xf32> to vector<1x1x128xf32>
    %105 = vector.broadcast %104 : vector<1x1x128xf32> to vector<2x16x128xf32>
    %106 = arith.mulf %101, %105 : vector<2x16x128xf32>
    %107 = vector.shape_cast %6 : vector<2x128xf32> to vector<2x1x128xf32>
    %cst_30 = arith.constant 1.000000e+00 : f32
    %108 = vector.broadcast %cst_30 : f32 to vector<2x1x128xf32>
    %109 = arith.addf %107, %108 : vector<2x1x128xf32>
    %110 = vector.broadcast %109 : vector<2x1x128xf32> to vector<2x16x128xf32>
    %111 = arith.mulf %106, %110 : vector<2x16x128xf32>
    %112 = vector.shape_cast %7 : vector<2x128xf32> to vector<2x1x128xf32>
    %113 = vector.broadcast %112 : vector<2x1x128xf32> to vector<2x16x128xf32>
    %114 = arith.addf %111, %113 : vector<2x16x128xf32>
    %115 = vector.shape_cast %114 : vector<2x16x128xf32> to vector<32x128xf32>
    %c0_31 = arith.constant 0 : index
    %c0_32 = arith.constant 0 : index
    %c0_33 = arith.constant 0 : index
    %116 = vector.load %arg7[%c0_31, %c0_32, %c0_33] : memref<1x128x512xbf16, #tpu.memory_space<vmem>>, vector<1x128x512xbf16>
    %117 = vector.shape_cast %116 : vector<1x128x512xbf16> to vector<128x512xbf16>
    %118 = arith.truncf %115 : vector<32x128xf32> to vector<32x128xbf16>
    %cst_34 = arith.constant dense<0.000000e+00> : vector<32x512xf32>
    %119 = tpu.matmul %118, %117, %cst_34 {dimension_numbers = #tpu.dot_dimension_numbers<[1], [0], [0], [1], [0, 0, 1, 1], [], []>} : vector<32x128xbf16>, vector<128x512xbf16>, vector<32x512xf32> -> vector<32x512xf32>
    %120 = vector.extract_strided_slice %119 {offsets = [0, 0], sizes = [32, 256], strides = [1, 1]} : vector<32x512xf32> to vector<32x256xf32>
    %121 = vector.extract_strided_slice %119 {offsets = [0, 256], sizes = [32, 256], strides = [1, 1]} : vector<32x512xf32> to vector<32x256xf32>
    %cst_35 = arith.constant 5.000000e-01 : f32
    %122 = vector.broadcast %cst_35 : f32 to vector<32x256xf32>
    %123 = arith.mulf %122, %121 : vector<32x256xf32>
    %cst_36 = arith.constant 4.471500e-02 : f32
    %124 = vector.broadcast %cst_36 : f32 to vector<32x256xf32>
    %125 = arith.mulf %124, %121 : vector<32x256xf32>
    %126 = arith.mulf %125, %121 : vector<32x256xf32>
    %127 = arith.mulf %126, %121 : vector<32x256xf32>
    %128 = arith.addf %121, %127 : vector<32x256xf32>
    %cst_37 = arith.constant 0.797884583 : f32
    %129 = vector.broadcast %cst_37 : f32 to vector<32x256xf32>
    %130 = arith.mulf %129, %128 : vector<32x256xf32>
    %131 = math.tanh %130 : vector<32x256xf32>
    %cst_38 = arith.constant 1.000000e+00 : f32
    %132 = vector.broadcast %cst_38 : f32 to vector<32x256xf32>
    %133 = arith.addf %132, %131 : vector<32x256xf32>
    %134 = arith.mulf %123, %133 : vector<32x256xf32>
    %135 = arith.mulf %120, %134 : vector<32x256xf32>
    %c0_39 = arith.constant 0 : index
    %c0_40 = arith.constant 0 : index
    %c0_41 = arith.constant 0 : index
    %136 = vector.load %arg8[%c0_39, %c0_40, %c0_41] : memref<1x256x128xbf16, #tpu.memory_space<vmem>>, vector<1x256x128xbf16>
    %137 = vector.shape_cast %136 : vector<1x256x128xbf16> to vector<256x128xbf16>
    %138 = arith.truncf %135 : vector<32x256xf32> to vector<32x256xbf16>
    %cst_42 = arith.constant dense<0.000000e+00> : vector<32x128xf32>
    %139 = tpu.matmul %138, %137, %cst_42 {dimension_numbers = #tpu.dot_dimension_numbers<[1], [0], [0], [1], [0, 0, 1, 1], [], []>} : vector<32x256xbf16>, vector<256x128xbf16>, vector<32x128xf32> -> vector<32x128xf32>
    %140 = vector.shape_cast %139 : vector<32x128xf32> to vector<2x16x128xf32>
    %141 = arith.addf %91, %140 : vector<2x16x128xf32>
    %c0_43 = arith.constant 0 : index
    %c0_44 = arith.constant 0 : index
    %c0_45 = arith.constant 0 : index
    %142 = vector.load %arg9[%c0_43, %c0_44, %c0_45] : memref<2x16x128xf32, #tpu.memory_space<vmem>>, vector<2x16x128xf32>
    tpu.vector_store %arg9[%c0_43, %c0_44, %c0_45], %141 {strides = array<i32>} : memref<2x16x128xf32, #tpu.memory_space<vmem>>, vector<2x16x128xf32>,
    return
  }
}

</mosaic_0001>

<bundles_post_ra>
// kernel: transformer_layer.1
= control target key start
LH: loop header
LB: loop body
LE: loop exit
PB: predicated region body
PF: predicated region fallthrough
CT: control target
= control target key end

     0   :  { %14 = vsyncpa [#allocation3], 0  ;;  %s3840_s0 = inlined_call_operand.vmem [shape: f32[2,16,128], index: 0, kind: input, shape index: {}]   ;;  %s3841_s1 = inlined_call_operand.vmem [shape: f32[8,16,16], index: 1, kind: input, shape index: {}]   ;;  %s3842_s2 = inlined_call_operand.vmem [shape: f32[1,2,512], index: 2, kind: input, shape index: {}]   ;;  %s3843_s3 = inlined_call_operand.vmem [shape: f32[1,128], index: 3, kind: input, shape index: {}]   ;;  %s3844_s4 = inlined_call_operand.vmem [shape: f32[1,128], index: 4, kind: input, shape index: {}]   ;;  %s3845_s5 = inlined_call_operand.vmem [shape: bf16[1,128,384], index: 5, kind: input, shape index: {}]   ;;  %s3846_s6 = inlined_call_operand.hbm [shape: bf16[1,128,128], index: 6, kind: input, shape index: {}]   ;;  %s3847_s7 = inlined_call_operand.vmem [shape: bf16[1,128,512], index: 7, kind: input, shape index: {}]   ;;  %s3848_s8 = inlined_call_operand.hbm [shape: bf16[1,256,128], index: 8, kind: input, shape index: {}]   ;;  %s3849_s9 = inlined_call_operand.hbm [shape: f32[2,16,128], index: 9, kind: output, shape index: {}]  }
   0x1   :  { %15 = vsyncpa [#allocation6], 0 }
   0x2   :  { %16 = vsyncpa [#allocation4], 0  ;;  %s33_s11 = sshll.u32 %s3846_s6, 4  ;;  %s2985_s12 = smov [#allocation2]   ;;  %s34_s11 = int_to_ptr.hbm [resolvable:$true] %s33_s11 }
   0x3   :  { %s35_s13 = sshll.u32 %s2985_s12, 4  ;;  %s48_s16 = sshll.u32 %s3848_s8, 4  ;;  %s36_s13 = int_to_ptr.vmem [resolvable:$true] %s35_s13  ;;  %s49_s16 = int_to_ptr.hbm [resolvable:$true] %s48_s16 }
   0x4   :  { %s2986_s17 = smov 64   ;;  %s2987_s18 = smov 4  }
   0x5   :  { %41 = dma.hbm_to_vmem [thread:$0]  %s34_s11, 1024, %s36_s13, [#allocation3], %s2986_s17, %s2986_s17, %s2987_s18  }
   0x6   :  { %s2988_s19 = smov [#allocation5]  }
   0x7   :  { %s50_s20 = sshll.u32 %s2988_s19, 4  ;;  %s51_s20 = int_to_ptr.vmem [resolvable:$true] %s50_s20 }
   0x8   :  { %56 = dma.hbm_to_vmem [thread:$0]  %s49_s16, 2048, %s51_s20, [#allocation6], %s2986_s17, %s2986_s17, %s2987_s18  }
   0x9   :  { %2979 = dma.done.wait [#allocation3], 1024  }
   0xa   :  { %2980 = vsyncadd [#allocation3], 4294966272 }
   0xb   :  { %2981 = dma.done.wait [#allocation6], 2048  }
   0xc   :  { %2982 = vsyncadd [#allocation6], 4294965248  ;;  %v3058_v0 = vld [vmem:[%s3840_s0 + $0x10] sm:$0xff]  ;;  %v3063_v1 = vld [vmem:[%s3840_s0] sm:$0xff]  ;;  %v2989_v8 = vmov 128.0   ;;  %vm170_vm1 = vcmask 1040384  }
   0xd   :  { %v89_v2 = vmul.f32 %v3058_v0, %v3058_v0  ;;  %v87_v3 = vmul.f32 %v3063_v1, %v3063_v1  ;;  %v3072_v4 = vld [vmem:[%s3840_s0 + $0x18] sm:$0xff]  ;;  %v3077_v5 = vld [vmem:[%s3840_s0 + $0x8] sm:$0xff]  ;;  %2805 = vrcp.f32 %v2989_v8  ;;  %v2615_v10 = vld [vmem:[%s3845_s5 + $0xb0] sm:$0xf0]  ;;  %vm172_vm2 = vcmask 1042434   ;;  %s2991_s16 = smov 32  }
   0xe   :  { %v90_v6 = vmul.f32 %v3072_v4, %v3072_v4  ;;  %v88_v7 = vmul.f32 %v3077_v5, %v3077_v5  ;;  %v2343_v9 = vld [vmem:[%s3845_s5 + $0xa8] sm:$0xf]  ;;  %v2614_v11 = vld [vmem:[%s3845_s5 + $0xac] sm:$0xf]  ;;  %v2345_v13 = vld [vmem:[%s3845_s5 + $0xb4] sm:$0xf0] }
   0xf   :  { %95 = vadd.xlane.f32.xlu1 %v89_v2  ;;  %91 = vadd.xlane.f32.xlu0 %v87_v3  ;;  %v2344_v12 = vor.u32 %v2615_v10, %v2343_v9  ;;  %v2351_v14 = vld [vmem:[%s3845_s5 + $0xb0] sm:$0xf]  ;;  %v2616_v15 = vld [vmem:[%s3845_s5 + $0xb8] sm:$0xf0]  ;;  %v2348_v16 = vor.u32 %v2614_v11, %v2345_v13  ;;  %v2611_v21 = vld [vmem:[%s3845_s5 + $0x94] sm:$0xf] }
  0x10   :  { %v2352_v17 = vor.u32 %v2616_v15, %v2351_v14  ;;  %v2331_v19 = vld [vmem:[%s3845_s5 + $0x90] sm:$0xf]  ;;  %v2612_v20 = vld [vmem:[%s3845_s5 + $0x98] sm:$0xf0]  ;;  %v2333_v23 = vld [vmem:[%s3845_s5 + $0x9c] sm:$0xf0] }
  0x11   :  { %369 = vmatpush.bf16.msra.mxu0 %v2344_v12  ;;  %388 = vmatpush.bf16.msra.mxu1 %v2348_v16  ;;  %v2332_v22 = vor.u32 %v2612_v20, %v2331_v19  ;;  %v2339_v24 = vld [vmem:[%s3845_s5 + $0x98] sm:$0xf]  ;;  %v2613_v25 = vld [vmem:[%s3845_s5 + $0xa0] sm:$0xf0]  ;;  %v2336_v27 = vor.u32 %v2611_v21, %v2333_v23  ;;  %v2608_v31 = vld [vmem:[%s3845_s5 + $0x7c] sm:$0xf] }
  0x12   :  { %407 = vmatpush.bf16.msra.mxu2 %v2352_v17  ;;  %v2340_v28 = vor.u32 %v2613_v25, %v2339_v24  ;;  %v2319_v29 = vld [vmem:[%s3845_s5 + $0x78] sm:$0xf]  ;;  %v2609_v30 = vld [vmem:[%s3845_s5 + $0x80] sm:$0xf0]  ;;  %v2321_v33 = vld [vmem:[%s3845_s5 + $0x84] sm:$0xf0] }
  0x13   :  { %v3101_v18 = vpop.eup %2805  ;;  %v2320_v32 = vor.u32 %v2609_v30, %v2319_v29  ;;  %v2327_v34 = vld [vmem:[%s3845_s5 + $0x80] sm:$0xf]  ;;  %v2610_v35 = vld [vmem:[%s3845_s5 + $0x88] sm:$0xf0]  ;;  %v2324_v37 = vor.u32 %v2608_v31, %v2321_v33  ;;  %v2605_v41 = vld [vmem:[%s3845_s5 + $0x64] sm:$0xf] }
  0x14   :  { %v100_v26 = vmul.f32 128.0, %v3101_v18  ;;  %v2328_v38 = vor.u32 %v2610_v35, %v2327_v34  ;;  %v2307_v39 = vld [vmem:[%s3845_s5 + $0x60] sm:$0xf]  ;;  %v2606_v40 = vld [vmem:[%s3845_s5 + $0x68] sm:$0xf0]  ;;  %vm104_vm0 = vweird.f32 %v3101_v18  ;;  %vm174_vm4 = vcmask 1041408  }
  0x15   :  { %370 = vmatpush.bf16.msra.mxu0 %v2332_v22  ;;  %389 = vmatpush.bf16.msra.mxu1 %v2336_v27  ;;  %v2308_v42 = vor.u32 %v2606_v40, %v2307_v39  ;;  %v2309_v43 = vld [vmem:[%s3845_s5 + $0x6c] sm:$0xf0]  ;;  %v2315_v44 = vld [vmem:[%s3845_s5 + $0x68] sm:$0xf]  ;;  %v2607_v45 = vld [vmem:[%s3845_s5 + $0x70] sm:$0xf0] }
  0x16   :  { %408 = vmatpush.bf16.msra.mxu2 %v2340_v28  ;;  %v101_v36 = vsub.f32 1.0, %v100_v26  ;;  %v2312_v47 = vor.u32 %v2605_v41, %v2309_v43  ;;  %v2316_v48 = vor.u32 %v2607_v45, %v2315_v44  ;;  %v2295_v49 = vld [vmem:[%s3845_s5 + $0x48] sm:$0xf]  ;;  %v2603_v50 = vld [vmem:[%s3845_s5 + $0x50] sm:$0xf0]  ;;  %v86_v41 = vld [vmem:[%s3842_s2] sm:$0xff] }
  0x17   :  { %97 = vadd.xlane.f32.xlu1 %v90_v6  ;;  %93 = vadd.xlane.f32.xlu0 %v88_v7  ;;  %v2602_v51 = vld [vmem:[%s3845_s5 + $0x4c] sm:$0xf]  ;;  %v2296_v52 = vor.u32 %v2603_v50, %v2295_v49  ;;  %v2297_v53 = vld [vmem:[%s3845_s5 + $0x54] sm:$0xf0]  ;;  %v2303_v54 = vld [vmem:[%s3845_s5 + $0x50] sm:$0xf] }
  0x18   :  { %v102_v46 = vmul.f32 %v3101_v18, %v101_v36  ;;  %v2604_v55 = vld [vmem:[%s3845_s5 + $0x58] sm:$0xf0]  ;;  %v2300_v57 = vor.u32 %v2602_v51, %v2297_v53  ;;  %v2283_v59 = vld [vmem:[%s3845_s5 + $0x30] sm:$0xf]  ;;  %v2599_v61 = vld [vmem:[%s3845_s5 + $0x34] sm:$0xf] }
  0x19   :  { %371 = vmatpush.bf16.msra.mxu0 %v2320_v32  ;;  %390 = vmatpush.bf16.msra.mxu1 %v2324_v37  ;;  %v2304_v58 = vor.u32 %v2604_v55, %v2303_v54  ;;  %v2600_v60 = vld [vmem:[%s3845_s5 + $0x38] sm:$0xf0]  ;;  %v2285_v63 = vld [vmem:[%s3845_s5 + $0x3c] sm:$0xf0]  ;;  %v2291_v2 = vld [vmem:[%s3845_s5 + $0x38] sm:$0xf] }
  0x1a   :  { %409 = vmatpush.bf16.msra.mxu2 %v2328_v38  ;;  %v103_v56 = vadd.f32 %v3101_v18, %v102_v46  ;;  %v2284_v62 = vor.u32 %v2600_v60, %v2283_v59  ;;  %v2601_v3 = vld [vmem:[%s3845_s5 + $0x40] sm:$0xf0]  ;;  %v2288_v7 = vor.u32 %v2599_v61, %v2285_v63  ;;  %v2271_v11 = vld [vmem:[%s3845_s5 + $0x18] sm:$0xf]  ;;  %v2596_v13 = vld [vmem:[%s3845_s5 + $0x1c] sm:$0xf] }
  0x1b   :  { %v2292_v8 = vor.u32 %v2601_v3, %v2291_v2  ;;  %v2597_v12 = vld [vmem:[%s3845_s5 + $0x20] sm:$0xf0]  ;;  %v2273_v16 = vld [vmem:[%s3845_s5 + $0x24] sm:$0xf0]  ;;  %v2279_v17 = vld [vmem:[%s3845_s5 + $0x20] sm:$0xf] }
  0x1c   :  { %v3198_v6 = vsel %vm104_vm0, %v3101_v18, %v103_v56  ;;  %v2272_v15 = vor.u32 %v2597_v12, %v2271_v11  ;;  %v2598_v18 = vld [vmem:[%s3845_s5 + $0x28] sm:$0xf0]  ;;  %v2276_v20 = vor.u32 %v2596_v13, %v2273_v16  ;;  %v2259_v22 = vld [vmem:[%s3845_s5] sm:$0xf]  ;;  %v2593_v24 = vld [vmem:[%s3845_s5 + $0x4] sm:$0xf] }
  0x1d   :  { %372 = vmatpush.bf16.msra.mxu0 %v2308_v42  ;;  %391 = vmatpush.bf16.msra.mxu1 %v2312_v47  ;;  %v2280_v21 = vor.u32 %v2598_v18, %v2279_v17  ;;  %v2594_v23 = vld [vmem:[%s3845_s5 + $0x8] sm:$0xf0]  ;;  %v2261_v27 = vld [vmem:[%s3845_s5 + $0xc] sm:$0xf0]  ;;  %v2267_v29 = vld [vmem:[%s3845_s5 + $0x8] sm:$0xf] }
  0x1e   :  { %410 = vmatpush.bf16.msra.mxu2 %v2316_v48  ;;  %v2260_v26 = vor.u32 %v2594_v23, %v2259_v22  ;;  %v2264_v28 = vor.u32 %v2593_v24, %v2261_v27  ;;  %v2595_v30 = vld [vmem:[%s3845_s5 + $0x10] sm:$0xf0]  ;;  %v167_v44 = vrot.slane %v86_v41, 1  ;;  %v168_v45 = vrot.slane %v86_v41, 2  ;;  %v2803_v3 = vld [vmem:[%s3843_s3] ss:$0 sm:$0xff] }
  0x1f   :  { %v2268_v31 = vor.u32 %v2595_v30, %v2267_v29  ;;  %v169_v46 = vrot.slane %v86_v41, 3  ;;  %vm176_vm8 = vcmask 1041409   ;;  %vm178_vm10 = vcmask 1043459   ;;  %s2990_s3 = smov 96  }
  0x20   :  { %v171_v53 = vsel %vm170_vm1, %v86_v41, %v167_v44  ;;  %v177_v17 = vsel %vm176_vm8, %v86_v41, %v167_v44  ;;  %vm180_vm14 = vcmask 1042433  }
  0x21   :  { %373 = vmatpush.bf16.msra.mxu0 %v2296_v52  ;;  %392 = vmatpush.bf16.msra.mxu1 %v2300_v57  ;;  %v173_v54 = vsel %vm172_vm2, %v168_v45, %v169_v46  ;;  %v179_v18 = vsel %vm178_vm10, %v168_v45, %v169_v46 }
  0x22   :  { %411 = vmatpush.bf16.msra.mxu2 %v2304_v58  ;;  %v3251_v61 = vsel %vm174_vm4, %v171_v53, %v173_v54  ;;  %v181_v24 = vsel %vm180_vm14, %v177_v17, %v179_v18  ;;  %vm819_vm4 = vcmask 130048  }
  0x25   :  { %374 = vmatpush.bf16.msra.mxu0 %v2284_v62  ;;  %393 = vmatpush.bf16.msra.mxu1 %v2288_v7  ;;  %v185_v7 = vadd.f32 1.0, %v3251_v61 }
  0x26   :  { %412 = vmatpush.bf16.msra.mxu2 %v2292_v8 }
  0x27   :  { %v189_v13 = vperm.slane %v185_v7, 0 }
  0x29   :  { %375 = vmatpush.bf16.msra.mxu0 %v2272_v15  ;;  %394 = vmatpush.bf16.msra.mxu1 %v2276_v20 }
  0x2a   :  { %413 = vmatpush.bf16.msra.mxu2 %v2280_v21 }
  0x2d   :  { %376 = vmatpush.bf16.msra.mxu0 %v2260_v26  ;;  %395 = vmatpush.bf16.msra.mxu1 %v2264_v28  ;;  %v3263_v28 = vrot.slane %v181_v24, 1 }
  0x2e   :  { %414 = vmatpush.bf16.msra.mxu2 %v2268_v31 }
  0x82   :  { %v96_v9 = vpop.xlane.xlu1 %95  ;;  %v92_v10 = vpop.xlane.xlu0 %91 }
  0x83   :  { %v106_v14 = vmul.f32 %v3198_v6, %v92_v10  ;;  %v108_v19 = vmul.f32 %v3198_v6, %v96_v9 }
  0x85   :  { %v110_v25 = vadd.f32 1e-06, %v106_v14  ;;  %v3238_v32 = vadd.f32 1e-06, %v108_v19  ;;  %v197_v14 = vrot.slane %v3251_v61, 1 }
  0x87   :  { %2807 = vrsqrt.f32 %v110_v25  ;;  %vm120_vm5 = vweird.f32 %v110_v25  ;;  %vm140_vm15 = vweird.f32 %v3238_v32  ;;  %v199_v22 = vperm.slane %v197_v14, 0 }
  0x88   :  { %2809 = vrsqrt.f32 %v3238_v32 }
  0x8a   :  { %v98_v33 = vpop.xlane.xlu1 %97  ;;  %v94_v34 = vpop.xlane.xlu0 %93 }
  0x8b   :  { %v109_v35 = vmul.f32 %v3198_v6, %v98_v33  ;;  %v107_v36 = vmul.f32 %v3198_v6, %v94_v34  ;;  %v186_v33 = vadd.f32 1.0, %v3263_v28 }
  0x8d   :  { %v113_v37 = vadd.f32 1e-06, %v109_v35  ;;  %v111_v38 = vadd.f32 1e-06, %v107_v36  ;;  %v2808_v39 = vpop.eup %2807  ;;  %v190_v36 = vperm.slane %v186_v33, 0 }
  0x8e   :  { %v115_v40 = vmul.f32 %v2808_v39, %v110_v25  ;;  %v3246_v43 = vpop.eup %2809  ;;  %vm121_vm3 = vweird.f32 %v2808_v39 }
  0x8f   :  { %2811 = vrsqrt.f32 %v113_v37  ;;  %v135_v49 = vmul.f32 %v3246_v43, %v3238_v32  ;;  %vm122_vm6 = vmor %vm120_vm5, %vm121_vm3  ;;  %vm130_vm9 = vweird.f32 %v111_v38  ;;  %vm150_vm12 = vweird.f32 %v113_v37 }
  0x90   :  { %2813 = vrsqrt.f32 %v111_v38  ;;  %v116_v42 = vmul.f32 %v2808_v39, %v115_v40  ;;  %vm141_vm0 = vweird.f32 %v3246_v43  ;;  %vm588_vm3 = vcmask 261120  }
  0x91   :  { %v136_v58 = vmul.f32 %v3246_v43, %v135_v49  ;;  %vm142_vm2 = vmor %vm140_vm15, %vm141_vm0 }
  0x92   :  { %v117_v47 = vmul.f32 0.5, %v116_v42 }
  0x93   :  { %v137_v8 = vmul.f32 0.5, %v136_v58 }
  0x94   :  { %v118_v50 = vsub.f32 1.5, %v117_v47 }
  0x95   :  { %v2812_v48 = vpop.eup %2811 }
  0x96   :  { %v2814_v51 = vpop.eup %2813  ;;  %v145_v52 = vmul.f32 %v2812_v48, %v113_v37  ;;  %v119_v55 = vmul.f32 %v2808_v39, %v118_v50  ;;  %vm151_vm13 = vweird.f32 %v2812_v48  ;;  %v198_v37 = vrot.slane %v3263_v28, 1 }
  0x97   :  { %v125_v56 = vmul.f32 %v2814_v51, %v111_v38  ;;  %vm131_vm7 = vweird.f32 %v2814_v51  ;;  %vm152_vm1 = vmor %vm150_vm12, %vm151_vm13 }
  0x98   :  { %v146_v57 = vmul.f32 %v2812_v48, %v145_v52  ;;  %v123_v59 = vsel %vm122_vm6, %v2808_v39, %v119_v55  ;;  %vm132_vm11 = vmor %vm130_vm9, %vm131_vm7  ;;  %v200_v40 = vperm.slane %v198_v37, 0 }
  0x99   :  { %v126_v60 = vmul.f32 %v2814_v51, %v125_v56  ;;  %v154_v2 = vmul.f32 %v123_v59, %v3063_v1  ;;  %v138_v1 = vsub.f32 1.5, %v137_v8 }
  0x9a   :  { %v147_v62 = vmul.f32 0.5, %v146_v57 }
  0x9b   :  { %v127_v63 = vmul.f32 0.5, %v126_v60  ;;  %v162_v12 = vmul.f32 %v2803_v3, %v154_v2  ;;  %v139_v23 = vmul.f32 %v3246_v43, %v138_v1 }
  0x9c   :  { %v148_v10 = vsub.f32 1.5, %v147_v62 }
  0x9d   :  { %v128_v9 = vsub.f32 1.5, %v127_v63  ;;  %v193_v21 = vmul.f32 %v189_v13, %v162_v12  ;;  %v143_v29 = vsel %vm142_vm2, %v3246_v43, %v139_v23 }
  0x9e   :  { %v149_v19 = vmul.f32 %v2812_v48, %v148_v10  ;;  %v156_v32 = vmul.f32 %v143_v29, %v3058_v0 }
  0x9f   :  { %v129_v11 = vmul.f32 %v2814_v51, %v128_v9  ;;  %v203_v27 = vadd.f32 %v199_v22, %v193_v21 }
  0xa0   :  { %v153_v26 = vsel %vm152_vm1, %v2812_v48, %v149_v19  ;;  %v164_v35 = vmul.f32 %v2803_v3, %v156_v32 }
  0xa1   :  { %v133_v15 = vsel %vm132_vm11, %v2814_v51, %v129_v11  ;;  %v157_v30 = vmul.f32 %v153_v26, %v3072_v4 }
  0xa2   :  { %v155_v16 = vmul.f32 %v133_v15, %v3077_v5  ;;  %v195_v39 = vmul.f32 %v190_v36, %v164_v35 }
  0xa3   :  { %v165_v34 = vmul.f32 %v2803_v3, %v157_v30 }
  0xa4   :  { %v163_v20 = vmul.f32 %v2803_v3, %v155_v16  ;;  %v205_v42 = vadd.f32 %v200_v40, %v195_v39 }
  0xa5   :  { %v196_v38 = vmul.f32 %v190_v36, %v165_v34 }
  0xa6   :  { %v194_v25 = vmul.f32 %v189_v13, %v163_v20 }
  0xa7   :  { %v206_v41 = vadd.f32 %v200_v40, %v196_v38 }
  0xa8   :  { %v204_v5 = vadd.f32 %v199_v22, %v194_v25 }
  0xa9   :  { %v240_v43 = vpack.c.bf16 %v206_v41, %v205_v42 }
  0xaa   :  { %v239_v31 = vpack.c.bf16 %v204_v5, %v203_v27 }
  0xac   :  { %377 = vmatmul.bf16.vlgmr.msra.gmra.mxu0 %v239_v31  ;;  %396 = vmatmul.bf16.vlgmr.msra.gmra.mxu1 %v239_v31 }
  0xad   :  { %415 = vmatmul.bf16.vlgmr.msra.gmra.mxu2 %v239_v31 }
  0xbc   :  { %382 = vmatmul.bf16.gmra.mxu0 %v240_v43  ;;  %401 = vmatmul.bf16.gmra.mxu1 %v240_v43 }
  0xbd   :  { %420 = vmatmul.bf16.gmra.mxu2 %v240_v43 }
 0x129   :  { %v378_v0 = vpop.f32.mrf.mxu0  ;;  %v397_v4 = vpop.f32.mrf.mxu1 }
 0x12a   :  { %v562_v45 = vpack.c.bf16 %v397_v4, %v397_v4  ;;  %v546_v55 = vpack.c.bf16 %v378_v0, %v378_v0 }
 0x12c   :  { %v585_v50 = vunpack.c.l.b16 %v562_v45  ;;  %v580_v8 = vunpack.c.l.b16 %v546_v55 }
 0x130   :  { %v416_v44 = vpop.f32.mrf.mxu2 }
 0x131   :  { %v380_v46 = vpop.f32.mrf.mxu0  ;;  %v399_v47 = vpop.f32.mrf.mxu1  ;;  %v1220_v54 = vpack.c.bf16 %v416_v44, %v416_v44 }
 0x132   :  { %v2683_v48 = vpack.i.bf16 %v399_v47, %v397_v4  ;;  %v563_v49 = vpack.c.bf16 %v399_v47, %v399_v47  ;;  %v547_v52 = vpack.c.bf16 %v380_v46, %v380_v46  ;;  %v2688_v63 = vpack.i.bf16 %v380_v46, %v378_v0 }
 0x133   :  { %v1243_v3 = vunpack.c.l.b16 %v1220_v54 }
 0x134   :  { %2684 = vrot.lane.b32.xlu2 %v2683_v48, %s2990_s3  ;;  %v586_v51 = vunpack.c.l.b16 %v563_v49  ;;  %v581_v2 = vunpack.c.l.b16 %v547_v52 }
 0x136   :  { %v587_v53 = vpack.c.b16 %v586_v51, %v585_v50  ;;  %v582_v10 = vpack.c.b16 %v581_v2, %v580_v8 }
 0x138   :  { %v418_v56 = vpop.f32.mrf.mxu2  ;;  %v593_v57 = vsel %vm588_vm3, %v587_v53, 0 }
 0x139   :  { %v383_v58 = vpop.f32.mrf.mxu0  ;;  %v402_v59 = vpop.f32.mrf.mxu1  ;;  %602 = vmatpush.bf16.xpose.msra.mxu3 %v593_v57  ;;  %v1221_v60 = vpack.c.bf16 %v418_v56, %v418_v56  ;;  %v3272_v62 = vpack.i.bf16 %v418_v56, %v416_v44 }
 0x13a   :  { %v564_v11 = vpack.c.bf16 %v402_v59, %v402_v59  ;;  %v548_v20 = vpack.c.bf16 %v383_v58, %v383_v58 }
 0x13b   :  { %v1244_v7 = vunpack.c.l.b16 %v1221_v60 }
 0x13c   :  { %2689 = vrot.lane.b32.xlu2 %v2688_v63, %s2990_s3  ;;  %v616_v16 = vunpack.c.l.b16 %v564_v11  ;;  %v611_v23 = vunpack.c.l.b16 %v548_v20 }
 0x13d   :  { %v1245_v9 = vpack.c.b16 %v1244_v7, %v1243_v3 }
 0x13f   :  { %1257 = vmatpush.bf16.msrb.mxu0 %v1245_v9 }
 0x140   :  { %2353 = vmatmul.msk.bf16.vlgmr.msra.gmra.mxu3 %vm588_vm3, %v582_v10  ;;  %v3295_v9 = vpop.f32.mrf.mxu2 }
 0x141   :  { %v385_v12 = vpop.f32.mrf.mxu0  ;;  %v404_v13 = vpop.f32.mrf.mxu1 }
 0x142   :  { %v2693_v14 = vpack.i.bf16 %v404_v13, %v402_v59  ;;  %v2698_v1 = vpack.i.bf16 %v385_v12, %v383_v58  ;;  %v565_v15 = vpack.c.bf16 %v404_v13, %v404_v13  ;;  %v549_v18 = vpack.c.bf16 %v385_v12, %v385_v12 }
 0x144   :  { %2694 = vrot.lane.b32.xlu0 %v2693_v14, %s2990_s3  ;;  %2704 = vrot.lane.b32.xlu2 %v2683_v48, %s2986_s17  ;;  %v617_v17 = vunpack.c.l.b16 %v565_v15  ;;  %v612_v22 = vunpack.c.l.b16 %v549_v18 }
 0x145   :  { %2699 = vrot.lane.b32.xlu1 %v2698_v1, %s2990_s3 }
 0x146   :  { %v618_v19 = vpack.c.b16 %v617_v17, %v616_v16  ;;  %v613_v24 = vpack.c.b16 %v612_v22, %v611_v23 }
 0x148   :  { %v623_v21 = vsel %vm588_vm3, %v618_v19, 0 }
 0x149   :  { %632 = vmatpush.bf16.xpose.msrb.mxu3 %v623_v21 }
 0x14c   :  { %2719 = vrot.lane.b32.xlu0 %v2688_v63, %s2991_s16  ;;  %2709 = vrot.lane.b32.xlu2 %v2683_v48, %s2991_s16 }
 0x14d   :  { %2729 = vrot.lane.b32.xlu1 %v2698_v1, %s2991_s16 }
 0x150   :  { %2354 = vmatmul.msk.bf16.vlgmr.msrb.gmra.mxu3 %vm588_vm3, %v613_v24 }
 0x154   :  { %2734 = vrot.lane.b32.xlu0 %v2693_v14, %s2986_s17  ;;  %2714 = vrot.lane.b32.xlu2 %v2688_v63, %s2986_s17 }
 0x155   :  { %2744 = vrot.lane.b32.xlu1 %v3272_v62, %s2990_s3 }
 0x15c   :  { %2724 = vrot.lane.b32.xlu2 %v2693_v14, %s2991_s16 }
 0x164   :  { %2739 = vrot.lane.b32.xlu2 %v2698_v1, %s2986_s17 }
 0x18e   :  { %v2685_v25 = vpop.permute.xlu2 %2684 }
 0x18f   :  { %v2687_v26 = vunpack.i.h.bf16 %v2685_v25  ;;  %v2686_v27 = vunpack.i.l.bf16 %v2685_v25 }
 0x191   :  { %v567_v5 = vpack.c.bf16 %v2687_v26, %v2687_v26  ;;  %v566_v29 = vpack.c.bf16 %v2686_v27, %v2686_v27 }
 0x193   :  { %v647_v30 = vunpack.c.l.b16 %v567_v5  ;;  %v646_v31 = vunpack.c.l.b16 %v566_v29  ;;  %v70_v29 = vld [vmem:[%s3841_s1] sm:$0xff] }
 0x195   :  { %v648_v32 = vpack.c.b16 %v647_v30, %v646_v31 }
 0x196   :  { %v2690_v33 = vpop.permute.xlu2 %2689 }
 0x197   :  { %v2692_v34 = vunpack.i.h.bf16 %v2690_v33  ;;  %v2691_v35 = vunpack.i.l.bf16 %v2690_v33  ;;  %v653_v36 = vsel %vm588_vm3, %v648_v32, 0 }
 0x198   :  { %662 = vmatpush.bf16.xpose.msra.mxu3 %v653_v36 }
 0x199   :  { %v551_v37 = vpack.c.bf16 %v2692_v34, %v2692_v34  ;;  %v550_v38 = vpack.c.bf16 %v2691_v35, %v2691_v35  ;;  %v3304_v35 = vpop.f32.mrf.mxu2 }
 0x19b   :  { %v642_v39 = vunpack.c.l.b16 %v551_v37  ;;  %v641_v40 = vunpack.c.l.b16 %v550_v38 }
 0x19d   :  { %v643_v41 = vpack.c.b16 %v642_v39, %v641_v40 }
 0x19e   :  { %v2705_v42 = vpop.permute.xlu2 %2704 }
 0x19f   :  { %2355 = vmatmul.msk.bf16.vlgmr.msra.gmra.mxu3 %vm588_vm3, %v643_v41  ;;  %v2707_v51 = vunpack.i.h.bf16 %v2705_v42  ;;  %v2706_v52 = vunpack.i.l.bf16 %v2705_v42 }
 0x1a1   :  { %v571_v53 = vpack.c.bf16 %v2707_v51, %v2707_v51  ;;  %v570_v54 = vpack.c.bf16 %v2706_v52, %v2706_v52 }
 0x1a3   :  { %v707_v2 = vunpack.c.l.b16 %v571_v53  ;;  %v706_v3 = vunpack.c.l.b16 %v570_v54  ;;  %v71_v54 = vld [vmem:[%s3841_s1 + $0x8] sm:$0xff] }
 0x1a5   :  { %v708_v15 = vpack.c.b16 %v707_v2, %v706_v3 }
 0x1a6   :  { %v2710_v43 = vpop.permute.xlu2 %2709 }
 0x1a7   :  { %v2712_v0 = vunpack.i.h.bf16 %v2710_v43  ;;  %v2711_v4 = vunpack.i.l.bf16 %v2710_v43  ;;  %v713_v5 = vsel %vm588_vm3, %v708_v15, 0  ;;  %v1223_v43 = vpack.c.bf16 %v3304_v35, %v3304_v35 }
 0x1a9   :  { %v575_v44 = vpack.c.bf16 %v2712_v0, %v2712_v0  ;;  %v574_v45 = vpack.c.bf16 %v2711_v4, %v2711_v4 }
 0x1ab   :  { %v767_v46 = vunpack.c.l.b16 %v575_v44  ;;  %v766_v47 = vunpack.c.l.b16 %v574_v45  ;;  %v1222_v45 = vpack.c.bf16 %v3295_v9, %v3295_v9 }
 0x1ad   :  { %v768_v48 = vpack.c.b16 %v767_v46, %v766_v47 }
 0x1ae   :  { %v3292_v49 = vpop.permute.xlu2 %2714 }
 0x1af   :  { %v773_v50 = vsel %vm588_vm3, %v768_v48, 0 }
 0x1b0   :  { %782 = vmatpush.bf16.xpose.msrb.mxu2 %v773_v50 }
 0x1b6   :  { %v2695_v55 = vpop.permute.xlu0 %2694  ;;  %v2725_v56 = vpop.permute.xlu2 %2724 }
 0x1b7   :  { %v2697_v57 = vunpack.i.h.bf16 %v2695_v55  ;;  %v2696_v58 = vunpack.i.l.bf16 %v2695_v55  ;;  %v2700_v59 = vpop.permute.xlu1 %2699  ;;  %v2727_v60 = vunpack.i.h.bf16 %v2725_v56  ;;  %v2726_v63 = vunpack.i.l.bf16 %v2725_v56 }
 0x1b8   :  { %v2702_v10 = vunpack.i.h.bf16 %v2700_v59  ;;  %v2701_v11 = vunpack.i.l.bf16 %v2700_v59  ;;  %v2717_v55 = vunpack.i.h.bf16 %v3292_v49  ;;  %v2716_v56 = vunpack.i.l.bf16 %v3292_v49 }
 0x1b9   :  { %v569_v7 = vpack.c.bf16 %v2697_v57, %v2697_v57  ;;  %v568_v8 = vpack.c.bf16 %v2696_v58, %v2696_v58  ;;  %v577_v14 = vpack.c.bf16 %v2727_v60, %v2727_v60  ;;  %v576_v1 = vpack.c.bf16 %v2726_v63, %v2726_v63 }
 0x1ba   :  { %v553_v17 = vpack.c.bf16 %v2702_v10, %v2702_v10  ;;  %v552_v18 = vpack.c.bf16 %v2701_v11, %v2701_v11  ;;  %v1272_v59 = vunpack.c.l.b16 %v1223_v43  ;;  %v1271_v10 = vunpack.c.l.b16 %v1222_v45 }
 0x1bb   :  { %v677_v12 = vunpack.c.l.b16 %v569_v7  ;;  %v676_v13 = vunpack.c.l.b16 %v568_v8  ;;  %v797_v23 = vunpack.c.l.b16 %v577_v14  ;;  %v796_v24 = vunpack.c.l.b16 %v576_v1 }
 0x1bc   :  { %v672_v30 = vunpack.c.l.b16 %v553_v17  ;;  %v671_v31 = vunpack.c.l.b16 %v552_v18  ;;  %v555_v14 = vpack.c.bf16 %v2717_v55, %v2717_v55  ;;  %v554_v1 = vpack.c.bf16 %v2716_v56, %v2716_v56 }
 0x1bd   :  { %v678_v16 = vpack.c.b16 %v677_v12, %v676_v13  ;;  %v798_v36 = vpack.c.b16 %v797_v23, %v796_v24  ;;  %v1273_v17 = vpack.c.b16 %v1272_v59, %v1271_v10  ;;  %v80_v59 = vld [vmem:[%s3841_s1 + $0x50] sm:$0xff] }
 0x1be   :  { %v2720_v19 = vpop.permute.xlu0 %2719  ;;  %v673_v39 = vpack.c.b16 %v672_v30, %v671_v31  ;;  %v2740_v40 = vpop.permute.xlu2 %2739  ;;  %v701_v23 = vunpack.c.l.b16 %v554_v1 }
 0x1bf   :  { %v2722_v20 = vunpack.i.h.bf16 %v2720_v19  ;;  %v2721_v21 = vunpack.i.l.bf16 %v2720_v19  ;;  %v3297_v22 = vpop.permute.xlu1 %2729  ;;  %v683_v25 = vsel %vm588_vm3, %v678_v16, 0  ;;  %v803_v48 = vsel %vm588_vm3, %v798_v36, 0 }
 0x1c0   :  { %692 = vmatpush.bf16.xpose.msrb.mxu3 %v683_v25  ;;  %v2742_v50 = vunpack.i.h.bf16 %v2740_v40  ;;  %v2741_v51 = vunpack.i.l.bf16 %v2740_v40  ;;  %v2732_v30 = vunpack.i.h.bf16 %v3297_v22  ;;  %v2731_v31 = vunpack.i.l.bf16 %v3297_v22 }
 0x1c1   :  { %v559_v26 = vpack.c.bf16 %v2722_v20, %v2722_v20  ;;  %v558_v27 = vpack.c.bf16 %v2721_v21, %v2721_v21  ;;  %v72_v20 = vld [vmem:[%s3841_s1 + $0x10] sm:$0xff]  ;;  %v702_v21 = vunpack.c.l.b16 %v555_v14 }
 0x1c2   :  { %v557_v11 = vpack.c.bf16 %v2742_v50, %v2742_v50  ;;  %v556_v12 = vpack.c.bf16 %v2741_v51, %v2741_v51  ;;  %v560_v36 = vpack.c.bf16 %v2731_v31, %v2731_v31  ;;  %v82_v51 = vld [vmem:[%s3841_s1 + $0x60] sm:$0xff] }
 0x1c3   :  { %v762_v32 = vunpack.c.l.b16 %v559_v26  ;;  %v761_v33 = vunpack.c.l.b16 %v558_v27  ;;  %v604_v34 = vpop.f32.mrf.mxu3  ;;  %v703_v27 = vpack.c.b16 %v702_v21, %v701_v23 }
 0x1c4   :  { %v3306_v37 = vadd.f32 %v604_v34, %v70_v29  ;;  %v732_v18 = vunpack.c.l.b16 %v557_v11  ;;  %v731_v19 = vunpack.c.l.b16 %v556_v12  ;;  %v73_v29 = vld [vmem:[%s3841_s1 + $0x18] sm:$0xff]  ;;  %v561_v34 = vpack.c.bf16 %v2732_v30, %v2732_v30 }
 0x1c5   :  { %v763_v38 = vpack.c.b16 %v762_v32, %v761_v33  ;;  %v791_v40 = vunpack.c.l.b16 %v560_v36  ;;  %v84_v36 = vld [vmem:[%s3841_s1 + $0x70] sm:$0xff] }
 0x1c6   :  { %v2735_v41 = vpop.permute.xlu0 %2734  ;;  %v820_v42 = vsel %vm819_vm4, %v3306_v37, -inf  ;;  %v733_v26 = vpack.c.b16 %v732_v18, %v731_v19  ;;  %v81_v18 = vld [vmem:[%s3841_s1 + $0x58] sm:$0xff] }
 0x1c7   :  { %v2737_v0 = vunpack.i.h.bf16 %v2735_v41  ;;  %v2736_v4 = vunpack.i.l.bf16 %v2735_v41  ;;  %v2745_v44 = vpop.permute.xlu1 %2744  ;;  %2359 = vmatmul.msk.bf16.vlgmr.msrb.gmra.mxu2 %vm588_vm3, %v763_v38  ;;  %821 = vmax.xlane.f32.xlu2 %v820_v42  ;;  %v74_v42 = vld [vmem:[%s3841_s1 + $0x20] sm:$0xff] }
 0x1c8   :  { %722 = vmatpush.bf16.xpose.msra.mxu3 %v713_v5  ;;  %v2747_v46 = vunpack.i.h.bf16 %v2745_v44  ;;  %v2746_v47 = vunpack.i.l.bf16 %v2745_v44 }
 0x1c9   :  { %2356 = vmatmul.msk.bf16.vlgmr.msrb.gmra.mxu3 %vm588_vm3, %v673_v39  ;;  %v573_v52 = vpack.c.bf16 %v2737_v0, %v2737_v0  ;;  %v572_v53 = vpack.c.bf16 %v2736_v4, %v2736_v4  ;;  %v792_v39 = vunpack.c.l.b16 %v561_v34  ;;  %v75_v4 = vld [vmem:[%s3841_s1 + $0x28] sm:$0xff] }
 0x1ca   :  { %v1225_v57 = vpack.c.bf16 %v2747_v46, %v2747_v46  ;;  %v1224_v58 = vpack.c.bf16 %v2746_v47, %v2746_v47  ;;  %v79_v34 = vld [vmem:[%s3841_s1 + $0x48] sm:$0xff] }
 0x1cb   :  { %v737_v60 = vunpack.c.l.b16 %v573_v52  ;;  %v736_v63 = vunpack.c.l.b16 %v572_v53  ;;  %v606_v2 = vpop.f32.mrf.mxu3  ;;  %v793_v41 = vpack.c.b16 %v792_v39, %v791_v40 }
 0x1cc   :  { %v1300_v3 = vunpack.c.l.b16 %v1225_v57  ;;  %v1299_v7 = vunpack.c.l.b16 %v1224_v58  ;;  %v3322_v8 = vadd.f32 %v606_v2, %v71_v54  ;;  %v83_v57 = vld [vmem:[%s3841_s1 + $0x68] sm:$0xff] }
 0x1cd   :  { %v738_v13 = vpack.c.b16 %v737_v60, %v736_v63 }
 0x1ce   :  { %v1301_v15 = vpack.c.b16 %v1300_v3, %v1299_v7  ;;  %v823_v49 = vsel %vm819_vm4, %v3322_v8, -inf }
 0x1cf   :  { %824 = vmax.xlane.f32.xlu1 %v823_v49  ;;  %v743_v16 = vsel %vm588_vm3, %v738_v13, 0  ;;  %v76_v13 = vld [vmem:[%s3841_s1 + $0x30] sm:$0xff] }
 0x1d0   :  { %812 = vmatpush.bf16.xpose.msrb.mxu3 %v803_v48  ;;  %1313 = vmatpush.bf16.msra.mxu2 %v1301_v15  ;;  %v77_v15 = vld [vmem:[%s3841_s1 + $0x38] sm:$0xff] }
 0x1d1   :  { %752 = vmatpush.bf16.xpose.msrb.mxu1 %v743_v16 }
 0x1d3   :  { %v634_v24 = vpop.f32.mrf.mxu3 }
 0x1d4   :  { %v3330_v25 = vadd.f32 %v634_v24, %v72_v20 }
 0x1d6   :  { %v826_v5 = vsel %vm819_vm4, %v3330_v25, -inf }
 0x1d7   :  { %827 = vmax.xlane.f32.xlu2 %v826_v5 }
 0x1d8   :  { %2358 = vmatmul.msk.bf16.vlgmr.msrb.gmra.mxu1 %vm588_vm3, %v733_v26 }
 0x1d9   :  { %1285 = vmatpush.bf16.msra.mxu1 %v1273_v17  ;;  %2357 = vmatmul.msk.bf16.vlgmr.msra.gmra.mxu3 %vm588_vm3, %v703_v27 }
 0x1db   :  { %v636_v32 = vpop.f32.mrf.mxu3 }
 0x1dc   :  { %v637_v33 = vadd.f32 %v636_v32, %v73_v29 }
 0x1de   :  { %v829_v38 = vsel %vm819_vm4, %v637_v33, -inf }
 0x1df   :  { %830 = vmax.xlane.f32.xlu1 %v829_v38 }
 0x1e9   :  { %2360 = vmatmul.msk.bf16.vlgmr.msrb.gmra.mxu3 %vm588_vm3, %v793_v41 }
 0x222   :  { %v664_v43 = vpop.f32.mrf.mxu3 }
 0x223   :  { %v3346_v0 = vadd.f32 %v664_v43, %v74_v42  ;;  %v78_v43 = vld [vmem:[%s3841_s1 + $0x40] sm:$0xff] }
 0x225   :  { %v832_v22 = vsel %vm819_vm4, %v3346_v0, -inf }
 0x226   :  { %833 = vmax.xlane.f32.xlu1 %v832_v22 }
 0x22a   :  { %v666_v44 = vpop.f32.mrf.mxu3 }
 0x22b   :  { %v3353_v45 = vadd.f32 %v666_v44, %v75_v4 }
 0x22d   :  { %v835_v46 = vsel %vm819_vm4, %v3353_v45, -inf }
 0x22e   :  { %836 = vmax.xlane.f32.xlu0 %v835_v46 }
 0x23a   :  { %v822_v47 = vpop.xlane.xlu2 %821 }
 0x23b   :  { %v868_v48 = vsub.f32 %v3306_v37, %v822_v47  ;;  %v85_v47 = vld [vmem:[%s3841_s1 + $0x78] sm:$0xff]  ;;  %s2243_s1 = sshll.u32 %s3849_s9, 4  ;;  %s2244_s1 = int_to_ptr.hbm [resolvable:$true] %s2243_s1 }
 0x23d   :  { %v884_v50 = vmul.f32 1.442695, %v868_v48 }
 0x23f   :  { %2815 = vpow2.f32 %v884_v50 }
 0x242   :  { %v825_v53 = vpop.xlane.xlu1 %824 }
 0x243   :  { %v869_v3 = vsub.f32 %v3322_v8, %v825_v53 }
 0x245   :  { %v3368_v37 = vpop.eup %2815  ;;  %v886_v8 = vmul.f32 1.442695, %v869_v3 }
 0x246   :  { %v916_v12 = vsel %vm819_vm4, %v3368_v37, 0.0 }
 0x247   :  { %2817 = vpow2.f32 %v886_v8 }
 0x24a   :  { %v784_v52 = vpop.f32.mrf.mxu2  ;;  %v828_v16 = vpop.xlane.xlu2 %827 }
 0x24b   :  { %v3361_v55 = vadd.f32 %v784_v52, %v82_v51  ;;  %v870_v21 = vsub.f32 %v3330_v25, %v828_v16 }
 0x24c   :  { %v694_v54 = vpop.f32.mrf.mxu3 }
 0x24d   :  { %v856_v56 = vsel %vm819_vm4, %v3361_v55, -inf  ;;  %v3390_v49 = vadd.f32 %v694_v54, %v76_v13  ;;  %v888_v29 = vmul.f32 1.442695, %v870_v21  ;;  %v3406_v30 = vpop.eup %2817 }
 0x24e   :  { %857 = vmax.xlane.f32.xlu1 %v856_v56  ;;  %v919_v32 = vsel %vm819_vm4, %v3406_v30, 0.0 }
 0x24f   :  { %v838_v26 = vsel %vm819_vm4, %v3390_v49, -inf }
 0x252   :  { %v786_v58 = vpop.f32.mrf.mxu2  ;;  %v831_v2 = vpop.xlane.xlu1 %830 }
 0x253   :  { %v3373_v63 = vadd.f32 %v786_v58, %v83_v57  ;;  %v871_v14 = vsub.f32 %v637_v33, %v831_v2 }
 0x254   :  { %v696_v60 = vpop.f32.mrf.mxu3 }
 0x255   :  { %v754_v7 = vpop.f32.mrf.mxu1  ;;  %v859_v11 = vsel %vm819_vm4, %v3373_v63, -inf  ;;  %v890_v17 = vmul.f32 1.442695, %v871_v14  ;;  %v3395_v19 = vadd.f32 %v696_v60, %v77_v15 }
 0x256   :  { %v3376_v10 = vadd.f32 %v754_v7, %v80_v59  ;;  %860 = vmax.xlane.f32.xlu0 %v859_v11  ;;  %917 = vadd.xlane.f32.xlu1 %v916_v12 }
 0x257   :  { %2819 = vpow2.f32 %v890_v17  ;;  %v841_v5 = vsel %vm819_vm4, %v3395_v19, -inf }
 0x258   :  { %v850_v1 = vsel %vm819_vm4, %v3376_v10, -inf  ;;  %2821 = vpow2.f32 %v888_v29 }
 0x259   :  { %851 = vmax.xlane.f32.xlu2 %v850_v1 }
 0x25c   :  { %v724_v20 = vpop.f32.mrf.mxu3 }
 0x25d   :  { %v756_v23 = vpop.f32.mrf.mxu1  ;;  %v3408_v31 = vpop.eup %2819  ;;  %v3435_v44 = vadd.f32 %v724_v20, %v78_v43 }
 0x25e   :  { %v3398_v24 = vadd.f32 %v756_v23, %v81_v18  ;;  %839 = vmax.xlane.f32.xlu0 %v838_v26  ;;  %v925_v33 = vsel %vm819_vm4, %v3408_v31, 0.0  ;;  %v3420_v38 = vpop.eup %2821 }
 0x25f   :  { %v922_v42 = vsel %vm819_vm4, %v3420_v38, 0.0  ;;  %v844_v46 = vsel %vm819_vm4, %v3435_v44, -inf }
 0x260   :  { %v853_v27 = vsel %vm819_vm4, %v3398_v24, -inf }
 0x261   :  { %854 = vmax.xlane.f32.xlu1 %v853_v27  ;;  %842 = vmax.xlane.f32.xlu2 %v841_v5 }
 0x264   :  { %v726_v25 = vpop.f32.mrf.mxu3 }
 0x265   :  { %v3422_v39 = vadd.f32 %v726_v25, %v79_v34 }
 0x266   :  { %920 = vadd.xlane.f32.xlu0 %v919_v32 }
 0x267   :  { %v847_v4 = vsel %vm819_vm4, %v3422_v39, -inf }
 0x269   :  { %926 = vadd.xlane.f32.xlu2 %v925_v33 }
 0x26c   :  { %v814_v40 = vpop.f32.mrf.mxu3 }
 0x26d   :  { %v3424_v41 = vadd.f32 %v814_v40, %v84_v36 }
 0x26e   :  { %923 = vadd.xlane.f32.xlu0 %v922_v42 }
 0x26f   :  { %v862_v22 = vsel %vm819_vm4, %v3424_v41, -inf }
 0x270   :  { %863 = vmax.xlane.f32.xlu1 %v862_v22 }
 0x271   :  { %848 = vmax.xlane.f32.xlu2 %v847_v4 }
 0x274   :  { %v816_v48 = vpop.f32.mrf.mxu3 }
 0x275   :  { %v3442_v50 = vadd.f32 %v816_v48, %v85_v47 }
 0x276   :  { %845 = vmax.xlane.f32.xlu0 %v844_v46 }
 0x277   :  { %v865_v51 = vsel %vm819_vm4, %v3442_v50, -inf }
 0x27e   :  { %866 = vmax.xlane.f32.xlu0 %v865_v51 }
 0x299   :  { %v834_v52 = vpop.xlane.xlu1 %833 }
 0x29a   :  { %v872_v53 = vsub.f32 %v3346_v0, %v834_v52 }
 0x29c   :  { %v892_v54 = vmul.f32 1.442695, %v872_v53 }
 0x29e   :  { %2823 = vpow2.f32 %v892_v54 }
 0x2a1   :  { %v837_v56 = vpop.xlane.xlu0 %836 }
 0x2a2   :  { %v873_v57 = vsub.f32 %v3353_v45, %v837_v56 }
 0x2a4   :  { %v3448_v58 = vpop.eup %2823  ;;  %v894_v59 = vmul.f32 1.442695, %v873_v57 }
 0x2a5   :  { %v928_v60 = vsel %vm819_vm4, %v3448_v58, 0.0 }
 0x2a6   :  { %2825 = vpow2.f32 %v894_v59  ;;  %929 = vadd.xlane.f32.xlu0 %v928_v60 }
 0x2ac   :  { %v3452_v2 = vpop.eup %2825 }
 0x2ad   :  { %v931_v3 = vsel %vm819_vm4, %v3452_v2, 0.0 }
 0x2ae   :  { %932 = vadd.xlane.f32.xlu2 %v931_v3 }
 0x2c1   :  { %v858_v0 = vpop.xlane.xlu1 %857 }
 0x2c2   :  { %v880_v7 = vsub.f32 %v3361_v55, %v858_v0 }
 0x2c4   :  { %v908_v11 = vmul.f32 1.442695, %v880_v7 }
 0x2c6   :  { %2827 = vpow2.f32 %v908_v11 }
 0x2c9   :  { %v861_v45 = vpop.xlane.xlu0 %860  ;;  %v918_v12 = vpop.xlane.xlu1 %917 }
 0x2ca   :  { %v881_v13 = vsub.f32 %v3373_v63, %v861_v45  ;;  %2829 = vrcp.f32 %v918_v12  ;;  %v975_v36 = vand.u32 2147483648, %v918_v12  ;;  %vm969_vm6 = vweird.f32 %v918_v12 }
 0x2cb   :  { %v973_v40 = vand.u32 2147483647, %v918_v12 }
 0x2cc   :  { %v852_v14 = vpop.xlane.xlu2 %851  ;;  %v3458_v1 = vpop.eup %2827  ;;  %v910_v8 = vmul.f32 1.442695, %v881_v13  ;;  %v976_v47 = vor.u32 1.1754944e-38, %v975_v36 }
 0x2cd   :  { %v952_v15 = vsel %vm819_vm4, %v3458_v1, 0.0  ;;  %v878_v20 = vsub.f32 %v3376_v10, %v852_v14  ;;  %vm974_vm8 = vcmp.eq.f32.partialorder %v973_v40, 8.507059e+37 }
 0x2ce   :  { %2831 = vpow2.f32 %v910_v8  ;;  %953 = vadd.xlane.f32.xlu0 %v952_v15 }
 0x2cf   :  { %v904_v25 = vmul.f32 1.442695, %v878_v20 }
 0x2d0   :  { %v2830_v16 = vpop.eup %2829 }
 0x2d1   :  { %v965_v17 = vmul.f32 %v2830_v16, %v918_v12  ;;  %v840_v18 = vpop.xlane.xlu0 %839  ;;  %vm970_vm5 = vweird.f32 %v2830_v16 }
 0x2d2   :  { %v874_v55 = vsub.f32 %v3390_v49, %v840_v18  ;;  %vm971_vm7 = vmor %vm969_vm6, %vm970_vm5 }
 0x2d3   :  { %v966_v63 = vsub.f32 1.0, %v965_v17 }
 0x2d4   :  { %v843_v21 = vpop.xlane.xlu2 %842  ;;  %v3464_v23 = vpop.eup %2831  ;;  %v896_v26 = vmul.f32 1.442695, %v874_v55 }
 0x2d5   :  { %v875_v27 = vsub.f32 %v3395_v19, %v843_v21  ;;  %v955_v5 = vsel %vm819_vm4, %v3464_v23, 0.0  ;;  %v967_v32 = vmul.f32 %v2830_v16, %v966_v63 }
 0x2d6   :  { %2833 = vpow2.f32 %v896_v26  ;;  %956 = vadd.xlane.f32.xlu2 %v955_v5 }
 0x2d7   :  { %v898_v29 = vmul.f32 1.442695, %v875_v27  ;;  %v968_v34 = vadd.f32 %v2830_v16, %v967_v32 }
 0x2d9   :  { %2835 = vpow2.f32 %v898_v29  ;;  %v921_v33 = vpop.xlane.xlu0 %920  ;;  %v972_v22 = vsel %vm971_vm7, %v2830_v16, %v968_v34 }
 0x2da   :  { %2837 = vrcp.f32 %v921_v33  ;;  %v977_v53 = vsel %vm974_vm8, %v976_v47, %v972_v22  ;;  %v987_v59 = vand.u32 2147483647, %v921_v33  ;;  %v989_v60 = vand.u32 2147483648, %v921_v33 }
 0x2db   :  { %2839 = vpow2.f32 %v904_v25  ;;  %vm983_vm10 = vweird.f32 %v921_v33  ;;  %v1188_v13 = vmul.f32 %v3368_v37, %v977_v53 }
 0x2dc   :  { %v927_v10 = vpop.xlane.xlu2 %926  ;;  %v3469_v49 = vpop.eup %2833  ;;  %vm988_vm13 = vcmp.eq.f32.partialorder %v987_v59, 8.507059e+37 }
 0x2dd   :  { %2841 = vrcp.f32 %v927_v10  ;;  %v934_v19 = vsel %vm819_vm4, %v3469_v49, 0.0  ;;  %v1017_v45 = vand.u32 2147483648, %v927_v10  ;;  %v1015_v15 = vand.u32 2147483647, %v927_v10 }
 0x2de   :  { %935 = vadd.xlane.f32.xlu2 %v934_v19  ;;  %vm1011_vm14 = vweird.f32 %v927_v10  ;;  %v1204_v26 = vpack.c.bf16 %v1188_v13, %v1188_v13 }
 0x2df   :  { %v3473_v42 = vpop.eup %2835  ;;  %v1018_v63 = vor.u32 1.1754944e-38, %v1017_v45  ;;  %vm1016_vm0 = vcmp.eq.f32.partialorder %v1015_v15, 8.507059e+37 }
 0x2e0   :  { %v2838_v43 = vpop.eup %2837  ;;  %v937_v4 = vsel %vm819_vm4, %v3473_v42, 0.0 }
 0x2e1   :  { %v3477_v46 = vpop.eup %2839  ;;  %v979_v48 = vmul.f32 %v2838_v43, %v921_v33  ;;  %938 = vadd.xlane.f32.xlu1 %v937_v4  ;;  %v924_v51 = vpop.xlane.xlu0 %923  ;;  %vm984_vm9 = vweird.f32 %v2838_v43 }
 0x2e2   :  { %2843 = vrcp.f32 %v924_v51  ;;  %2754 = vrot.lane.b32.xlu0 %v3272_v62, %s2991_s16  ;;  %v946_v11 = vsel %vm819_vm4, %v3477_v46, 0.0  ;;  %vm985_vm12 = vmor %vm983_vm10, %vm984_vm9  ;;  %v1003_v25 = vand.u32 2147483648, %v924_v51  ;;  %v1001_v33 = vand.u32 2147483647, %v924_v51 }
 0x2e3   :  { %v2842_v52 = vpop.eup %2841  ;;  %v980_v54 = vsub.f32 1.0, %v979_v48  ;;  %vm997_vm2 = vweird.f32 %v924_v51 }
 0x2e4   :  { %v1007_v56 = vmul.f32 %v2842_v52, %v927_v10  ;;  %v849_v57 = vpop.xlane.xlu2 %848  ;;  %vm1012_vm11 = vweird.f32 %v2842_v52  ;;  %v1238_v10 = vunpack.c.l.b16 %v1204_v26  ;;  %v1004_v4 = vor.u32 1.1754944e-38, %v1003_v25 }
 0x2e5   :  { %v877_v3 = vsub.f32 %v3422_v39, %v849_v57  ;;  %v981_v0 = vmul.f32 %v2838_v43, %v980_v54  ;;  %v990_v39 = vor.u32 1.1754944e-38, %v989_v60  ;;  %vm1013_vm15 = vmor %vm1011_vm14, %vm1012_vm11  ;;  %vm1002_vm6 = vcmp.eq.f32.partialorder %v1001_v33, 8.507059e+37  ;;  %v855_v57 = vpop.xlane.xlu1 %854 }
 0x2e6   :  { %v1008_v7 = vsub.f32 1.0, %v1007_v56  ;;  %947 = vadd.xlane.f32.xlu2 %v946_v11 }
 0x2e7   :  { %v902_v12 = vmul.f32 1.442695, %v877_v3  ;;  %v982_v14 = vadd.f32 %v2838_v43, %v981_v0  ;;  %v2748_v3 = vpack.i.bf16 %v3304_v35, %v3295_v9 }
 0x2e8   :  { %v1009_v8 = vmul.f32 %v2842_v52, %v1008_v7  ;;  %v2844_v16 = vpop.eup %2843 }
 0x2e9   :  { %2845 = vpow2.f32 %v902_v12  ;;  %v986_v17 = vsel %vm985_vm12, %v2838_v43, %v982_v14  ;;  %v993_v55 = vmul.f32 %v2844_v16, %v924_v51  ;;  %v846_v20 = vpop.xlane.xlu0 %845  ;;  %vm998_vm1 = vweird.f32 %v2844_v16 }
 0x2ea   :  { %v1010_v18 = vadd.f32 %v2842_v52, %v1009_v8  ;;  %v991_v21 = vsel %vm988_vm13, %v990_v39, %v986_v17  ;;  %vm999_vm5 = vmor %vm997_vm2, %vm998_vm1  ;;  %v876_v7 = vsub.f32 %v3435_v44, %v846_v20  ;;  %v879_v14 = vsub.f32 %v3398_v24, %v855_v57 }
 0x2eb   :  { %v994_v37 = vsub.f32 1.0, %v993_v55  ;;  %v1189_v5 = vmul.f32 %v3406_v30, %v991_v21 }
 0x2ec   :  { %v1014_v27 = vsel %vm1013_vm15, %v2842_v52, %v1010_v18  ;;  %v900_v11 = vmul.f32 1.442695, %v876_v7  ;;  %v906_v15 = vmul.f32 1.442695, %v879_v14 }
 0x2ed   :  { %v1019_v29 = vsel %vm1016_vm0, %v1018_v63, %v1014_v27  ;;  %v995_v32 = vmul.f32 %v2844_v16, %v994_v37  ;;  %v1205_v34 = vpack.c.bf16 %v1189_v5, %v1189_v5  ;;  %v864_v45 = vpop.xlane.xlu1 %863 }
 0x2ee   :  { %v1191_v19 = vmul.f32 %v3408_v31, %v1019_v29  ;;  %v882_v12 = vsub.f32 %v3424_v41, %v864_v45 }
 0x2ef   :  { %v3486_v36 = vpop.eup %2845  ;;  %v996_v40 = vadd.f32 %v2844_v16, %v995_v32  ;;  %v1239_v22 = vunpack.c.l.b16 %v1205_v34 }
 0x2f0   :  { %v943_v43 = vsel %vm819_vm4, %v3486_v36, 0.0  ;;  %v1207_v54 = vpack.c.bf16 %v1191_v19, %v1191_v19  ;;  %v912_v13 = vmul.f32 1.442695, %v882_v12 }
 0x2f1   :  { %944 = vadd.xlane.f32.xlu2 %v943_v43  ;;  %v1000_v30 = vsel %vm999_vm5, %v2844_v16, %v996_v40  ;;  %v867_v47 = vpop.xlane.xlu0 %866  ;;  %v1240_v48 = vpack.c.b16 %v1239_v22, %v1238_v10 }
 0x2f2   :  { %v1005_v52 = vsel %vm1002_vm6, %v1004_v4, %v1000_v30  ;;  %v883_v53 = vsub.f32 %v3442_v50, %v867_v47  ;;  %v1267_v59 = vunpack.c.l.b16 %v1207_v54 }
 0x2f3   :  { %v1190_v51 = vmul.f32 %v3420_v38, %v1005_v52  ;;  %2361 = vmatmul.msk.bf16.vlgmr.msrb.gmra.mxu0 %vm819_vm4, %v1240_v48 }
 0x2f4   :  { %v914_v31 = vmul.f32 1.442695, %v883_v53 }
 0x2f5   :  { %v1206_v56 = vpack.c.bf16 %v1190_v51, %v1190_v51 }
 0x2f6   :  { %2847 = vpow2.f32 %v914_v31 }
 0x2f7   :  { %v1266_v60 = vunpack.c.l.b16 %v1206_v56  ;;  %2849 = vpow2.f32 %v900_v11 }
 0x2f8   :  { %2851 = vpow2.f32 %v912_v13 }
 0x2f9   :  { %v1268_v0 = vpack.c.b16 %v1267_v59, %v1266_v60  ;;  %2853 = vpow2.f32 %v906_v15 }
 0x2fa   :  { %2749 = vrot.lane.b32.xlu1 %v2748_v3, %s2990_s3 }
 0x2fb   :  { %2362 = vmatmul.msk.bf16.vlgmr.msra.gmra.mxu1 %vm819_vm4, %v1268_v0 }
 0x2fc   :  { %v3499_v50 = vpop.eup %2847 }
 0x2fd   :  { %v961_v38 = vsel %vm819_vm4, %v3499_v50, 0.0  ;;  %v3504_v9 = vpop.eup %2849 }
 0x2fe   :  { %962 = vadd.xlane.f32.xlu2 %v961_v38  ;;  %v940_v35 = vsel %vm819_vm4, %v3504_v9, 0.0  ;;  %v3508_v44 = vpop.eup %2851 }
 0x2ff   :  { %v958_v8 = vsel %vm819_vm4, %v3508_v44, 0.0  ;;  %v3515_v16 = vpop.eup %2853 }
 0x300   :  { %v949_v24 = vsel %vm819_vm4, %v3515_v16, 0.0 }
 0x30c   :  { %941 = vadd.xlane.f32.xlu0 %v940_v35 }
 0x314   :  { %959 = vadd.xlane.f32.xlu0 %v958_v8 }
 0x316   :  { %2759 = vrot.lane.b32.xlu2 %v3272_v62, %s2986_s17 }
 0x319   :  { %v930_v41 = vpop.xlane.xlu0 %929 }
 0x31a   :  { %2855 = vrcp.f32 %v930_v41  ;;  %v1031_v21 = vand.u32 2147483648, %v930_v41  ;;  %vm1025_vm8 = vweird.f32 %v930_v41  ;;  %v1029_v62 = vand.u32 2147483647, %v930_v41 }
 0x31c   :  { %v1032_v5 = vor.u32 1.1754944e-38, %v1031_v21  ;;  %vm1030_vm10 = vcmp.eq.f32.partialorder %v1029_v62, 8.507059e+37 }
 0x320   :  { %v2856_v39 = vpop.eup %2855 }
 0x321   :  { %v1021_v17 = vmul.f32 %v2856_v39, %v930_v41  ;;  %v933_v18 = vpop.xlane.xlu2 %932  ;;  %vm1026_vm7 = vweird.f32 %v2856_v39 }
 0x322   :  { %2857 = vrcp.f32 %v933_v18  ;;  %vm1027_vm9 = vmor %vm1025_vm8, %vm1026_vm7  ;;  %v1045_v32 = vand.u32 2147483648, %v933_v18  ;;  %v1043_v34 = vand.u32 2147483647, %v933_v18  ;;  %vm1039_vm12 = vweird.f32 %v933_v18 }
 0x323   :  { %v1022_v55 = vsub.f32 1.0, %v1021_v17 }
 0x324   :  { %950 = vadd.xlane.f32.xlu1 %v949_v24  ;;  %v1046_v40 = vor.u32 1.1754944e-38, %v1045_v32  ;;  %vm1044_vm14 = vcmp.eq.f32.partialorder %v1043_v34, 8.507059e+37 }
 0x325   :  { %v1023_v20 = vmul.f32 %v2856_v39, %v1022_v55 }
 0x327   :  { %v1024_v63 = vadd.f32 %v2856_v39, %v1023_v20 }
 0x328   :  { %v2858_v26 = vpop.eup %2857  ;;  %2764 = vrot.lane.b32.xlu0 %v2748_v3, %s2991_s16 }
 0x329   :  { %v1028_v27 = vsel %vm1027_vm9, %v2856_v39, %v1024_v63  ;;  %v1035_v37 = vmul.f32 %v2858_v26, %v933_v18  ;;  %vm1040_vm11 = vweird.f32 %v2858_v26 }
 0x32a   :  { %v1033_v25 = vsel %vm1030_vm10, %v1032_v5, %v1028_v27  ;;  %vm1041_vm13 = vmor %vm1039_vm12, %vm1040_vm11 }
 0x32b   :  { %v1036_v29 = vsub.f32 1.0, %v1035_v37  ;;  %v1192_v10 = vmul.f32 %v3448_v58, %v1033_v25 }
 0x32d   :  { %v1037_v33 = vmul.f32 %v2858_v26, %v1036_v29  ;;  %v1208_v4 = vpack.c.bf16 %v1192_v10, %v1192_v10 }
 0x32f   :  { %v1038_v19 = vadd.f32 %v2858_v26, %v1037_v33  ;;  %v1294_v48 = vunpack.c.l.b16 %v1208_v4 }
 0x330   :  { %2769 = vrot.lane.b32.xlu0 %v2748_v3, %s2986_s17 }
 0x331   :  { %v1042_v43 = vsel %vm1041_vm13, %v2858_v26, %v1038_v19 }
 0x332   :  { %v1047_v22 = vsel %vm1044_vm14, %v1046_v40, %v1042_v43 }
 0x333   :  { %v1193_v30 = vmul.f32 %v3452_v2, %v1047_v22 }
 0x335   :  { %v1209_v47 = vpack.c.bf16 %v1193_v30, %v1193_v30 }
 0x337   :  { %v1295_v52 = vunpack.c.l.b16 %v1209_v47 }
 0x339   :  { %v1296_v53 = vpack.c.b16 %v1295_v52, %v1294_v48 }
 0x33b   :  { %2363 = vmatmul.msk.bf16.vlgmr.msra.gmra.mxu2 %vm819_vm4, %v1296_v53 }
 0x341   :  { %v954_v54 = vpop.xlane.xlu0 %953 }
 0x342   :  { %2859 = vrcp.f32 %v954_v54  ;;  %v1143_v59 = vand.u32 2147483648, %v954_v54  ;;  %vm1137_vm0 = vweird.f32 %v954_v54  ;;  %v1141_v3 = vand.u32 2147483647, %v954_v54 }
 0x344   :  { %v1144_v11 = vor.u32 1.1754944e-38, %v1143_v59  ;;  %vm1142_vm2 = vcmp.eq.f32.partialorder %v1141_v3, 8.507059e+37 }
 0x348   :  { %v2860_v58 = vpop.eup %2859 }
 0x349   :  { %v1133_v51 = vmul.f32 %v2860_v58, %v954_v54  ;;  %v957_v31 = vpop.xlane.xlu2 %956  ;;  %vm1138_vm15 = vweird.f32 %v2860_v58 }
 0x34a   :  { %2861 = vrcp.f32 %v957_v31  ;;  %vm1139_vm1 = vmor %vm1137_vm0, %vm1138_vm15  ;;  %v1157_v13 = vand.u32 2147483648, %v957_v31  ;;  %v1155_v15 = vand.u32 2147483647, %v957_v31  ;;  %vm1151_vm6 = vweird.f32 %v957_v31 }
 0x34b   :  { %v1134_v56 = vsub.f32 1.0, %v1133_v51 }
 0x34c   :  { %v1158_v24 = vor.u32 1.1754944e-38, %v1157_v13  ;;  %vm1156_vm8 = vcmp.eq.f32.partialorder %v1155_v15, 8.507059e+37 }
 0x34d   :  { %v1135_v57 = vmul.f32 %v2860_v58, %v1134_v56 }
 0x34f   :  { %v1136_v60 = vadd.f32 %v2860_v58, %v1135_v57 }
 0x350   :  { %v2862_v2 = vpop.eup %2861 }
 0x351   :  { %v1140_v0 = vsel %vm1139_vm1, %v2860_v58, %v1136_v60  ;;  %v1147_v7 = vmul.f32 %v2862_v2, %v957_v31  ;;  %v3524_v38 = vpop.xlane.xlu2 %935  ;;  %vm1152_vm5 = vweird.f32 %v2862_v2 }
 0x352   :  { %2863 = vrcp.f32 %v3524_v38  ;;  %v1145_v12 = vsel %vm1142_vm2, %v1144_v11, %v1140_v0  ;;  %vm1153_vm7 = vmor %vm1151_vm6, %vm1152_vm5  ;;  %v1059_v53 = vand.u32 2147483648, %v3524_v38  ;;  %vm1053_vm13 = vweird.f32 %v3524_v38 }
 0x353   :  { %v1148_v45 = vsub.f32 1.0, %v1147_v7  ;;  %v1200_v39 = vmul.f32 %v3458_v1, %v1145_v12  ;;  %v1057_v54 = vand.u32 2147483647, %v3524_v38 }
 0x354   :  { %v939_v35 = vpop.xlane.xlu1 %938  ;;  %v2755_v14 = vpop.permute.xlu0 %2754  ;;  %v1060_v56 = vor.u32 1.1754944e-38, %v1059_v53 }
 0x355   :  { %v1149_v8 = vmul.f32 %v2862_v2, %v1148_v45  ;;  %2865 = vrcp.f32 %v939_v35  ;;  %v2757_v41 = vunpack.i.h.bf16 %v2755_v14  ;;  %v2756_v18 = vunpack.i.l.bf16 %v2755_v14 }
 0x356   :  { %v1216_v5 = vpack.c.bf16 %v1200_v39, %v1200_v39  ;;  %vm1067_vm10 = vweird.f32 %v939_v35  ;;  %v1073_v4 = vand.u32 2147483648, %v939_v35  ;;  %v1071_v52 = vand.u32 2147483647, %v939_v35 }
 0x357   :  { %v1150_v17 = vadd.f32 %v2862_v2, %v1149_v8  ;;  %v1233_v20 = vpack.c.bf16 %v2757_v41, %v2757_v41  ;;  %v1232_v62 = vpack.c.bf16 %v2756_v18, %v2756_v18  ;;  %vm1058_vm0 = vcmp.eq.f32.partialorder %v1057_v54, 8.507059e+37 }
 0x358   :  { %v2864_v55 = vpop.eup %2863  ;;  %v1406_v40 = vunpack.c.l.b16 %v1216_v5  ;;  %v1074_v51 = vor.u32 1.1754944e-38, %v1073_v4  ;;  %vm1072_vm15 = vcmp.eq.f32.partialorder %v1071_v52, 8.507059e+37 }
 0x359   :  { %v1154_v21 = vsel %vm1153_vm7, %v2862_v2, %v1150_v17  ;;  %v1049_v63 = vmul.f32 %v2864_v55, %v3524_v38  ;;  %v1412_v27 = vunpack.c.l.b16 %v1233_v20  ;;  %v1411_v1 = vunpack.c.l.b16 %v1232_v62  ;;  %v3530_v30 = vpop.xlane.xlu2 %947 }
 0x35a   :  { %v1159_v26 = vsel %vm1156_vm8, %v1158_v24, %v1154_v21  ;;  %vm1054_vm11 = vweird.f32 %v2864_v55 }
 0x35b   :  { %v2866_v37 = vpop.eup %2865  ;;  %v1201_v29 = vmul.f32 %v3464_v23, %v1159_v26  ;;  %v1050_v25 = vsub.f32 1.0, %v1049_v63  ;;  %v1413_v34 = vpack.c.b16 %v1412_v27, %v1411_v1  ;;  %vm1055_vm14 = vmor %vm1053_vm13, %vm1054_vm11 }
 0x35c   :  { %v1063_v32 = vmul.f32 %v2866_v37, %v939_v35  ;;  %vm1068_vm9 = vweird.f32 %v2866_v37 }
 0x35d   :  { %v1217_v33 = vpack.c.bf16 %v1201_v29, %v1201_v29  ;;  %v1051_v10 = vmul.f32 %v2864_v55, %v1050_v25  ;;  %1425 = vmatpush.bf16.msrb.mxu2 %v1413_v34  ;;  %vm1069_vm12 = vmor %vm1067_vm10, %vm1068_vm9 }
 0x35e   :  { %v1064_v19 = vsub.f32 1.0, %v1063_v32 }
 0x35f   :  { %v1407_v43 = vunpack.c.l.b16 %v1217_v33  ;;  %v1052_v48 = vadd.f32 %v2864_v55, %v1051_v10 }
 0x360   :  { %v1065_v22 = vmul.f32 %v2866_v37, %v1064_v19 }
 0x361   :  { %v1408_v47 = vpack.c.b16 %v1407_v43, %v1406_v40  ;;  %v1056_v31 = vsel %vm1055_vm14, %v2864_v55, %v1052_v48 }
 0x362   :  { %v1066_v23 = vadd.f32 %v2866_v37, %v1065_v22  ;;  %v1061_v59 = vsel %vm1058_vm0, %v1060_v56, %v1056_v31 }
 0x363   :  { %2367 = vmatmul.msk.bf16.vlgmr.msrb.gmra.mxu2 %vm819_vm4, %v1408_v47  ;;  %v1194_v2 = vmul.f32 %v3469_v49, %v1061_v59 }
 0x364   :  { %v1070_v58 = vsel %vm1069_vm12, %v2866_v37, %v1066_v23  ;;  %v945_v60 = vpop.xlane.xlu2 %944 }
 0x365   :  { %v1075_v57 = vsel %vm1072_vm15, %v1074_v51, %v1070_v58  ;;  %2867 = vrcp.f32 %v945_v60  ;;  %v1210_v13 = vpack.c.bf16 %v1194_v2, %v1194_v2  ;;  %v1101_v1 = vand.u32 2147483648, %v945_v60 }
 0x366   :  { %v1195_v3 = vmul.f32 %v3473_v42, %v1075_v57  ;;  %vm1095_vm2 = vweird.f32 %v945_v60  ;;  %v1099_v33 = vand.u32 2147483647, %v945_v60 }
 0x367   :  { %v1322_v17 = vunpack.c.l.b16 %v1210_v13  ;;  %v1102_v43 = vor.u32 1.1754944e-38, %v1101_v1 }
 0x368   :  { %v1211_v45 = vpack.c.bf16 %v1195_v3, %v1195_v3  ;;  %vm1100_vm6 = vcmp.eq.f32.partialorder %v1099_v33, 8.507059e+37 }
 0x36a   :  { %v1323_v15 = vunpack.c.l.b16 %v1211_v45 }
 0x36b   :  { %v2868_v39 = vpop.eup %2867 }
 0x36c   :  { %v2750_v0 = vpop.permute.xlu1 %2749  ;;  %v1324_v42 = vpack.c.b16 %v1323_v15, %v1322_v17  ;;  %v1091_v18 = vmul.f32 %v2868_v39, %v945_v60  ;;  %vm1096_vm1 = vweird.f32 %v2868_v39 }
 0x36d   :  { %v2752_v7 = vunpack.i.h.bf16 %v2750_v0  ;;  %v2751_v11 = vunpack.i.l.bf16 %v2750_v0  ;;  %vm1097_vm5 = vmor %vm1095_vm2, %vm1096_vm1 }
 0x36e   :  { %v1092_v20 = vsub.f32 1.0, %v1091_v18 }
 0x36f   :  { %v1227_v38 = vpack.c.bf16 %v2752_v7, %v2752_v7  ;;  %v1226_v12 = vpack.c.bf16 %v2751_v11, %v2751_v11 }
 0x370   :  { %v1093_v27 = vmul.f32 %v2868_v39, %v1092_v20 }
 0x371   :  { %v1328_v35 = vunpack.c.l.b16 %v1227_v38  ;;  %v1327_v14 = vunpack.c.l.b16 %v1226_v12  ;;  %v3538_v8 = vpop.xlane.xlu2 %962 }
 0x372   :  { %2869 = vrcp.f32 %v3538_v8  ;;  %v1094_v25 = vadd.f32 %v2868_v39, %v1093_v27  ;;  %v1185_v2 = vand.u32 2147483648, %v3538_v8  ;;  %vm1179_vm12 = vweird.f32 %v3538_v8 }
 0x373   :  { %v1329_v41 = vpack.c.b16 %v1328_v35, %v1327_v14  ;;  %v1183_v38 = vand.u32 2147483647, %v3538_v8 }
 0x374   :  { %v1098_v10 = vsel %vm1097_vm5, %v2868_v39, %v1094_v25  ;;  %v1113_v25 = vand.u32 2147483647, %v3530_v30 }
 0x375   :  { %1341 = vmatpush.bf16.msra.mxu3 %v1329_v41  ;;  %v1103_v47 = vsel %vm1100_vm6, %v1102_v43, %v1098_v10  ;;  %vm1184_vm0 = vcmp.eq.f32.partialorder %v1183_v38, 8.507059e+37  ;;  %vm1109_vm6 = vweird.f32 %v3530_v30 }
 0x376   :  { %v1197_v58 = vmul.f32 %v3486_v36, %v1103_v47 }
 0x378   :  { %2364 = vmatmul.msk.bf16.vlgmr.msra.gmra.mxu3 %vm819_vm4, %v1324_v42  ;;  %v3542_v29 = vpop.eup %2869  ;;  %v1213_v7 = vpack.c.bf16 %v1197_v58, %v1197_v58 }
 0x379   :  { %v2760_v49 = vpop.permute.xlu2 %2759  ;;  %v1175_v32 = vmul.f32 %v3542_v29, %v3538_v8  ;;  %vm1180_vm11 = vweird.f32 %v3542_v29 }
 0x37a   :  { %v2762_v55 = vunpack.i.h.bf16 %v2760_v49  ;;  %v2761_v24 = vunpack.i.l.bf16 %v2760_v49  ;;  %vm3559_vm13 = vmor %vm1179_vm12, %vm1180_vm11  ;;  %v1351_v39 = vunpack.c.l.b16 %v1213_v7 }
 0x37b   :  { %v1176_v22 = vsub.f32 1.0, %v1175_v32 }
 0x37c   :  { %v1229_v21 = vpack.c.bf16 %v2762_v55, %v2762_v55  ;;  %v1228_v63 = vpack.c.bf16 %v2761_v24, %v2761_v24 }
 0x37d   :  { %v1177_v54 = vmul.f32 %v3542_v29, %v1176_v22 }
 0x37e   :  { %v1356_v62 = vunpack.c.l.b16 %v1229_v21  ;;  %v1355_v26 = vunpack.c.l.b16 %v1228_v63 }
 0x37f   :  { %v942_v37 = vpop.xlane.xlu0 %941  ;;  %v1178_v3 = vadd.f32 %v3542_v29, %v1177_v54 }
 0x380   :  { %v1357_v5 = vpack.c.b16 %v1356_v62, %v1355_v26  ;;  %2871 = vrcp.f32 %v942_v37  ;;  %v1087_v48 = vand.u32 2147483648, %v942_v37  ;;  %v1085_v53 = vand.u32 2147483647, %v942_v37 }
 0x381   :  { %2873 = vrcp.f32 %v3530_v30  ;;  %vm1081_vm8 = vweird.f32 %v942_v37  ;;  %v1182_v41 = vsel %vm3559_vm13, %v3542_v29, %v1178_v3  ;;  %vm1517_vm13 = vcmask 785408  }
 0x382   :  { %1369 = vmatpush.bf16.msra.mxu0 %v1357_v5  ;;  %v1088_v57 = vor.u32 1.1754944e-38, %v1087_v48  ;;  %vm1086_vm10 = vcmp.eq.f32.partialorder %v1085_v53, 8.507059e+37 }
 0x386   :  { %v2872_v34 = vpop.eup %2871 }
 0x387   :  { %v1077_v19 = vmul.f32 %v2872_v34, %v942_v37  ;;  %v960_v40 = vpop.xlane.xlu0 %959  ;;  %v3547_v23 = vpop.eup %2873  ;;  %vm1082_vm7 = vweird.f32 %v2872_v34  ;;  %v1115_v37 = vand.u32 2147483648, %v3530_v30 }
 0x388   :  { %2875 = vrcp.f32 %v960_v40  ;;  %v1105_v56 = vmul.f32 %v3547_v23, %v3530_v30  ;;  %vm1083_vm9 = vmor %vm1081_vm8, %vm1082_vm7  ;;  %v1171_v12 = vand.u32 2147483648, %v960_v40  ;;  %v1169_v15 = vand.u32 2147483647, %v960_v40 }
 0x389   :  { %v1078_v4 = vsub.f32 1.0, %v1077_v19  ;;  %vm1165_vm15 = vweird.f32 %v960_v40  ;;  %vm1110_vm5 = vweird.f32 %v3547_v23  ;;  %v1116_v19 = vor.u32 1.1754944e-38, %v1115_v37  ;;  %v2623_v37 = vld [vmem:[#allocation2 + $0x30] sm:$0xff] }
 0x38a   :  { %v1106_v45 = vsub.f32 1.0, %v1105_v56  ;;  %v1172_v18 = vor.u32 1.1754944e-38, %v1171_v12  ;;  %vm1170_vm2 = vcmp.eq.f32.partialorder %v1169_v15, 8.507059e+37  ;;  %vm1111_vm7 = vmor %vm1109_vm6, %vm1110_vm5  ;;  %vm1114_vm8 = vcmp.eq.f32.partialorder %v1113_v25, 8.507059e+37  ;;  %v2622_v25 = vld [vmem:[#allocation2 + $0x28] sm:$0xff] }
 0x38b   :  { %v1079_v52 = vmul.f32 %v2872_v34, %v1078_v4 }
 0x38c   :  { %v1107_v8 = vmul.f32 %v3547_v23, %v1106_v45 }
 0x38d   :  { %v1080_v51 = vadd.f32 %v2872_v34, %v1079_v52 }
 0x38e   :  { %v2876_v31 = vpop.eup %2875  ;;  %v1108_v62 = vadd.f32 %v3547_v23, %v1107_v8 }
 0x38f   :  { %v1084_v59 = vsel %vm1083_vm9, %v2872_v34, %v1080_v51  ;;  %v1161_v60 = vmul.f32 %v2876_v31, %v960_v40  ;;  %vm1166_vm14 = vweird.f32 %v2876_v31 }
 0x390   :  { %v1089_v0 = vsel %vm1086_vm10, %v1088_v57, %v1084_v59  ;;  %vm1167_vm1 = vmor %vm1165_vm15, %vm1166_vm14  ;;  %v1112_v34 = vsel %vm1111_vm7, %v3547_v23, %v1108_v62 }
 0x391   :  { %v1196_v36 = vmul.f32 %v3504_v9, %v1089_v0  ;;  %v1162_v11 = vsub.f32 1.0, %v1161_v60  ;;  %v1186_v9 = vor.u32 1.1754944e-38, %v1185_v2  ;;  %v1117_v4 = vsel %vm1114_vm8, %v1116_v19, %v1112_v34  ;;  %v2619_v34 = vld [vmem:[#allocation2 + $0x10] sm:$0xff]  ;;  %v2617_v19 = vld [vmem:[#allocation2] sm:$0xff] }
 0x392   :  { %v1198_v23 = vmul.f32 %v3477_v46, %v1117_v4 }
 0x393   :  { %v1212_v35 = vpack.c.bf16 %v1196_v36, %v1196_v36  ;;  %v1163_v14 = vmul.f32 %v2876_v31, %v1162_v11  ;;  %v1187_v49 = vsel %vm1184_vm0, %v1186_v9, %v1182_v41 }
 0x394   :  { %v1203_v26 = vmul.f32 %v3499_v50, %v1187_v49  ;;  %v1214_v11 = vpack.c.bf16 %v1198_v23, %v1198_v23  ;;  %v1287_v49 = vpop.f32.mrf.mxu1 }
 0x395   :  { %v1350_v17 = vunpack.c.l.b16 %v1212_v35  ;;  %v1164_v42 = vadd.f32 %v2876_v31, %v1163_v14 }
 0x396   :  { %v1219_v10 = vpack.c.bf16 %v1203_v26, %v1203_v26  ;;  %v1378_v46 = vunpack.c.l.b16 %v1214_v11  ;;  %v2624_v26 = vld [vmem:[#allocation2 + $0x38] sm:$0xff] }
 0x397   :  { %v1168_v55 = vsel %vm1167_vm1, %v2876_v31, %v1164_v42  ;;  %v951_v24 = vpop.xlane.xlu1 %950  ;;  %v1352_v20 = vpack.c.b16 %v1351_v39, %v1350_v17  ;;  %v1259_v42 = vpop.f32.mrf.mxu0  ;;  %1588 = vmatpush.bf16.msrb.mxu0 %v2624_v26  ;;  %v2515_v26 = vld [vmem:[%s3847_s7 + $0xe0] sm:$0xf] }
 0x398   :  { %v1173_v21 = vsel %vm1170_vm2, %v1172_v18, %v1168_v55  ;;  %2877 = vrcp.f32 %v951_v24  ;;  %v1435_v52 = vunpack.c.l.b16 %v1219_v10  ;;  %v1127_v53 = vand.u32 2147483647, %v951_v24  ;;  %v2618_v10 = vld [vmem:[#allocation2 + $0x8] sm:$0xff] }
 0x399   :  { %v1202_v63 = vmul.f32 %v3508_v44, %v1173_v21  ;;  %2365 = vmatmul.msk.bf16.vlgmr.msra.gmra.mxu0 %vm819_vm4, %v1352_v20  ;;  %v1129_v30 = vand.u32 2147483648, %v951_v24  ;;  %vm1123_vm10 = vweird.f32 %v951_v24 }
 0x39a   :  { %v2765_v27 = vpop.permute.xlu0 %2764  ;;  %vm1128_vm12 = vcmp.eq.f32.partialorder %v1127_v53, 8.507059e+37 }
 0x39b   :  { %v2767_v5 = vunpack.i.h.bf16 %v2765_v27  ;;  %v2766_v29 = vunpack.i.l.bf16 %v2765_v27  ;;  %v1218_v1 = vpack.c.bf16 %v1202_v63, %v1202_v63  ;;  %v1130_v3 = vor.u32 1.1754944e-38, %v1129_v30  ;;  %1589 = vmatpush.bf16.msrb.mxu0 %v2623_v37  ;;  %v2653_v37 = vld [vmem:[%s3847_s7 + $0xe4] sm:$0xf] }
 0x39c   :  { %v1289_v21 = vpop.f32.mrf.mxu1 }
 0x39d   :  { %v1235_v44 = vpack.c.bf16 %v2767_v5, %v2767_v5  ;;  %v1234_v32 = vpack.c.bf16 %v2766_v29, %v2766_v29  ;;  %v1434_v22 = vunpack.c.l.b16 %v1218_v1 }
 0x39e   :  { %v2878_v33 = vpop.eup %2877 }
 0x39f   :  { %v1119_v40 = vmul.f32 %v2878_v33, %v951_v24  ;;  %v1440_v50 = vunpack.c.l.b16 %v1235_v44  ;;  %v1439_v43 = vunpack.c.l.b16 %v1234_v32  ;;  %vm1124_vm9 = vweird.f32 %v2878_v33  ;;  %1590 = vmatpush.bf16.msrb.mxu0 %v2622_v25  ;;  %v2621_v44 = vld [vmem:[#allocation2 + $0x20] sm:$0xff]  ;;  %v2523_v25 = vld [vmem:[%s3847_s7 + $0xe8] sm:$0xf] }
 0x3a0   :  { %v1436_v56 = vpack.c.b16 %v1435_v52, %v1434_v22  ;;  %vm1125_vm11 = vmor %vm1123_vm10, %vm1124_vm9 }
 0x3a1   :  { %v1120_v47 = vsub.f32 1.0, %v1119_v40  ;;  %v1441_v48 = vpack.c.b16 %v1440_v50, %v1439_v43 }
 0x3a2   :  { %v2770_v54 = vpop.permute.xlu0 %2769 }
 0x3a3   :  { %v1121_v58 = vmul.f32 %v2878_v33, %v1120_v47  ;;  %v2772_v51 = vunpack.i.h.bf16 %v2770_v54  ;;  %v2771_v31 = vunpack.i.l.bf16 %v2770_v54  ;;  %1453 = vmatpush.bf16.msrb.mxu3 %v1441_v48  ;;  %1591 = vmatpush.bf16.msrb.mxu0 %v2621_v44 }
 0x3a5   :  { %v1122_v57 = vadd.f32 %v2878_v33, %v1121_v58  ;;  %v1231_v59 = vpack.c.bf16 %v2772_v51, %v2772_v51  ;;  %v1230_v60 = vpack.c.bf16 %v2771_v31, %v2771_v31 }
 0x3a6   :  { %2368 = vmatmul.msk.bf16.vlgmr.msrb.gmra.mxu3 %vm819_vm4, %v1436_v56 }
 0x3a7   :  { %v1126_v2 = vsel %vm1125_vm11, %v2878_v33, %v1122_v57  ;;  %v1384_v0 = vunpack.c.l.b16 %v1231_v59  ;;  %v1383_v7 = vunpack.c.l.b16 %v1230_v60  ;;  %v2620_v33 = vld [vmem:[#allocation2 + $0x18] sm:$0xff] }
 0x3a8   :  { %v1131_v36 = vsel %vm1128_vm12, %v1130_v3, %v1126_v2  ;;  %1592 = vmatpush.bf16.msrb.mxu0 %v2620_v33  ;;  %v2654_v33 = vld [vmem:[%s3847_s7 + $0xec] sm:$0xf] }
 0x3a9   :  { %v1199_v45 = vmul.f32 %v3515_v16, %v1131_v36  ;;  %v1385_v38 = vpack.c.b16 %v1384_v0, %v1383_v7  ;;  %v1261_v16 = vpop.f32.mrf.mxu0 }
 0x3ab   :  { %v1215_v12 = vpack.c.bf16 %v1199_v45, %v1199_v45  ;;  %1397 = vmatpush.bf16.msrb.mxu1 %v1385_v38 }
 0x3ac   :  { %1593 = vmatpush.bf16.msrb.mxu0 %v2619_v34  ;;  %v2525_v34 = vld [vmem:[%s3847_s7 + $0xf8] sm:$0xf0] }
 0x3ad   :  { %v1379_v13 = vunpack.c.l.b16 %v1215_v12 }
 0x3af   :  { %v1380_v35 = vpack.c.b16 %v1379_v13, %v1378_v46 }
 0x3b0   :  { %1594 = vmatpush.bf16.msrb.mxu0 %v2618_v10  ;;  %v2528_v10 = vor.u32 %v2654_v33, %v2525_v34  ;;  %v2636_v33 = vld [vmem:[%s3847_s7 + $0x54] sm:$0xf0] }
 0x3b1   :  { %2366 = vmatmul.msk.bf16.vlgmr.msrb.gmra.mxu1 %vm819_vm4, %v1380_v35  ;;  %vm1512_vm4 = vcmask 523264  }
 0x3b4   :  { %1595 = vmatpush.bf16.msrb.mxu0 %v2617_v19  ;;  %v2499_v19 = vld [vmem:[%s3847_s7 + $0xc0] sm:$0xf] }
 0x3b8   :  { %1960 = vmatpush.bf16.msra.mxu0 %v2528_v10 }
 0x3be   :  { %v1315_v14 = vpop.f32.mrf.mxu2 }
 0x3c6   :  { %v1317_v15 = vpop.f32.mrf.mxu2 }
 0x3c7   :  { %v2773_v41 = vpack.i.bf16 %v1317_v15, %v1315_v14 }
 0x3c9   :  { %2774 = vrot.lane.b32.xlu2 %v2773_v41, %s2991_s16  ;;  %v2903_v41 = vld [vmem:[%s3840_s0] sm:$0xff] }
 0x3e6   :  { %v1427_v9 = vpop.f32.mrf.mxu2 }
 0x3ee   :  { %v1429_v39 = vpop.f32.mrf.mxu2 }
 0x3ef   :  { %v2783_v17 = vpack.i.bf16 %v1429_v39, %v1427_v9 }
 0x3f1   :  { %2784 = vrot.lane.b32.xlu2 %v2783_v17, %s2990_s3 }
 0x3fb   :  { %v1343_v18 = vpop.f32.mrf.mxu3 }
 0x403   :  { %v1345_v20 = vpop.f32.mrf.mxu3 }
 0x404   :  { %v2788_v63 = vpack.i.bf16 %v1345_v20, %v1343_v18 }
 0x416   :  { %v1371_v8 = vpop.f32.mrf.mxu0 }
 0x41e   :  { %v1373_v55 = vpop.f32.mrf.mxu0 }
 0x41f   :  { %v2778_v24 = vpack.i.bf16 %v1373_v55, %v1371_v8 }
 0x421   :  { %2779 = vrot.lane.b32.xlu0 %v2778_v24, %s2986_s17 }
 0x423   :  { %v2775_v40 = vpop.permute.xlu2 %2774 }
 0x424   :  { %v2777_v50 = vunpack.i.h.bf16 %v2775_v40  ;;  %v2776_v43 = vunpack.i.l.bf16 %v2775_v40  ;;  %v2651_v40 = vld [vmem:[%s3847_s7 + $0xcc] sm:$0xf0] }
 0x426   :  { %v1509_v52 = vsel %vm588_vm3, %v1261_v16, %v2777_v50  ;;  %v1508_v53 = vsel %vm588_vm3, %v1259_v42, %v2776_v43  ;;  %v2904_v42 = vld [vmem:[%s3840_s0 + $0x8] sm:$0xff]  ;;  %v2649_v50 = vld [vmem:[%s3847_s7 + $0xc4] sm:$0xf]  ;;  %v2500_v43 = vor.u32 %v2651_v40, %v2499_v19  ;;  %v2445_v40 = vld [vmem:[%s3847_s7 + $0x58] sm:$0xf0] }
 0x427   :  { %v2634_v19 = vld [vmem:[%s3847_s7 + $0x4c] sm:$0xf] }
 0x429   :  { %v1455_v62 = vpop.f32.mrf.mxu3  ;;  %2789 = vrot.lane.b32.xlu0 %v2788_v63, %s2991_s16 }
 0x42e   :  { %v1399_v27 = vpop.f32.mrf.mxu1 }
 0x431   :  { %v1457_v5 = vpop.f32.mrf.mxu3 }
 0x432   :  { %v2798_v29 = vpack.i.bf16 %v1457_v5, %v1455_v62 }
 0x434   :  { %2799 = vrot.lane.b32.xlu2 %v2798_v29, %s2990_s3  ;;  %v2517_v29 = vld [vmem:[%s3847_s7 + $0xf0] sm:$0xf0]  ;;  %s2994_s3 = smov 8  }
 0x435   :  { %v2520_v44 = vor.u32 %v2653_v37, %v2517_v29  ;;  %v2635_v29 = vld [vmem:[%s3847_s7 + $0x4c] sm:$0xf0] }
 0x436   :  { %v1401_v1 = vpop.f32.mrf.mxu1 }
 0x437   :  { %v2793_v32 = vpack.i.bf16 %v1401_v1, %v1399_v27  ;;  %v2655_v27 = vld [vmem:[%s3847_s7 + $0xec] sm:$0xf0]  ;;  %v2656_v1 = vld [vmem:[%s3847_s7 + $0xf4] sm:$0xf0]  ;;  %1922 = vmatpush.bf16.msra.mxu2 %v2520_v44  ;;  %v2437_v44 = vld [vmem:[%s3847_s7 + $0x50] sm:$0xf0] }
 0x438   :  { %v2516_v5 = vor.u32 %v2655_v27, %v2515_v26  ;;  %v2638_v26 = vld [vmem:[%s3847_s7 + $0x6c] sm:$0xf]  ;;  %v2461_v27 = vld [vmem:[%s3847_s7 + $0x78] sm:$0xf0] }
 0x439   :  { %2794 = vrot.lane.b32.xlu1 %v2793_v32, %s2986_s17  ;;  %v2524_v32 = vor.u32 %v2656_v1, %v2523_v25  ;;  %v2464_v37 = vor.u32 %v2638_v26, %v2461_v27  ;;  %v2633_v25 = vld [vmem:[%s3847_s7 + $0x44] sm:$0xf]  ;;  %v2804_v27 = vld [vmem:[%s3844_s4] ss:$0 sm:$0xff]  ;;  %s2992_s4 = smov [#allocation7]   ;;  %s2993_s17 = smov 128  }
 0x43a   :  { %1903 = vmatpush.bf16.msra.mxu1 %v2516_v5  ;;  %v2435_v5 = vld [vmem:[%s3847_s7 + $0x40] sm:$0xf]  ;;  %v2440_v34 = vor.u32 %v2633_v25, %v2437_v44  ;;  %s2241_s22 = sshll.u32 %s2992_s4, 4  ;;  %s2242_s22 = int_to_ptr.vmem [resolvable:$true] %s2241_s22 }
 0x43b   :  { %1941 = vmatpush.bf16.msra.mxu3 %v2524_v32  ;;  %v2436_v1 = vor.u32 %v2635_v29, %v2435_v5  ;;  %v2443_v32 = vld [vmem:[%s3847_s7 + $0x48] sm:$0xf] }
 0x43c   :  { %v2444_v10 = vor.u32 %v2636_v33, %v2443_v32 }
 0x43e   :  { %1904 = vmatpush.bf16.msra.mxu1 %v2500_v43  ;;  %v2448_v43 = vor.u32 %v2634_v19, %v2445_v40 }
 0x44b   :  { %v2785_v22 = vpop.permute.xlu2 %2784 }
 0x44c   :  { %v2787_v30 = vunpack.i.h.bf16 %v2785_v22  ;;  %v2786_v54 = vunpack.i.l.bf16 %v2785_v22  ;;  %v2501_v22 = vld [vmem:[%s3847_s7 + $0xd0] sm:$0xf0] }
 0x48e   :  { %v2800_v3 = vpop.permute.xlu2 %2799 }
 0x48f   :  { %v2802_v36 = vunpack.i.h.bf16 %v2800_v3  ;;  %v2801_v11 = vunpack.i.l.bf16 %v2800_v3 }
 0x493   :  { %v2780_v4 = vpop.permute.xlu0 %2779 }
 0x494   :  { %v2782_v47 = vunpack.i.h.bf16 %v2780_v4  ;;  %v2781_v48 = vunpack.i.l.bf16 %v2780_v4  ;;  %v2507_v4 = vld [vmem:[%s3847_s7 + $0xc8] sm:$0xf] }
 0x496   :  { %v1514_v58 = vsel %vm1512_vm4, %v1509_v52, %v2782_v47  ;;  %v1513_v51 = vsel %vm1512_vm4, %v1508_v53, %v2781_v48  ;;  %v2652_v47 = vld [vmem:[%s3847_s7 + $0xd4] sm:$0xf0]  ;;  %v2504_v48 = vor.u32 %v2649_v50, %v2501_v22  ;;  %v2650_v53 = vld [vmem:[%s3847_s7 + $0xcc] sm:$0xf] }
 0x497   :  { %v1518_v31 = vsel %vm1517_vm13, %v1513_v51, %v2786_v54  ;;  %v1519_v23 = vsel %vm1517_vm13, %v1514_v58, %v2787_v30  ;;  %v2508_v52 = vor.u32 %v2652_v47, %v2507_v4  ;;  %v2509_v30 = vld [vmem:[%s3847_s7 + $0xd8] sm:$0xf0]  ;;  %v2483_v58 = vld [vmem:[%s3847_s7 + $0xa0] sm:$0xf]  ;;  %v2647_v51 = vld [vmem:[%s3847_s7 + $0xac] sm:$0xf0] }
 0x498   :  { %v1538_v56 = vpack.c.bf16 %v1519_v23, %v1518_v31  ;;  %v2512_v54 = vor.u32 %v2650_v53, %v2509_v30  ;;  %1923 = vmatpush.bf16.msra.mxu2 %v2504_v48  ;;  %v2645_v31 = vld [vmem:[%s3847_s7 + $0xa4] sm:$0xf]  ;;  %v2484_v23 = vor.u32 %v2647_v51, %v2483_v58  ;;  %v2419_v4 = vld [vmem:[%s3847_s7 + $0x20] sm:$0xf]  ;;  %v2631_v47 = vld [vmem:[%s3847_s7 + $0x2c] sm:$0xf0] }
 0x499   :  { %1942 = vmatpush.bf16.msra.mxu3 %v2508_v52  ;;  %v2629_v48 = vld [vmem:[%s3847_s7 + $0x24] sm:$0xf]  ;;  %v2420_v52 = vor.u32 %v2631_v47, %v2419_v4  ;;  %v2421_v53 = vld [vmem:[%s3847_s7 + $0x30] sm:$0xf0]  ;;  %v2427_v30 = vld [vmem:[%s3847_s7 + $0x28] sm:$0xf] }
 0x49a   :  { %1596 = vmatmul.bf16.vlgmr.msrb.gmra.mxu0 %v1538_v56  ;;  %v2485_v56 = vld [vmem:[%s3847_s7 + $0xb0] sm:$0xf0]  ;;  %1905 = vmatpush.bf16.msra.mxu1 %v2484_v23  ;;  %v2424_v51 = vor.u32 %v2629_v48, %v2421_v53  ;;  %v2630_v23 = vld [vmem:[%s3847_s7 + $0x2c] sm:$0xf] }
 0x49b   :  { %v2790_v57 = vpop.permute.xlu0 %2789  ;;  %1961 = vmatpush.bf16.msra.mxu0 %v2512_v54  ;;  %v2632_v54 = vld [vmem:[%s3847_s7 + $0x34] sm:$0xf0] }
 0x49c   :  { %v2792_v59 = vunpack.i.h.bf16 %v2790_v57  ;;  %v2791_v60 = vunpack.i.l.bf16 %v2790_v57  ;;  %v2491_v57 = vld [vmem:[%s3847_s7 + $0xa8] sm:$0xf] }
 0x49e   :  { %v1511_v45 = vsel %vm588_vm3, %v1289_v21, %v2792_v59  ;;  %v1510_v38 = vsel %vm588_vm3, %v1287_v49, %v2791_v60  ;;  %v2905_v49 = vld [vmem:[%s3840_s0 + $0x10] sm:$0xff]  ;;  %v2906_v21 = vld [vmem:[%s3840_s0 + $0x18] sm:$0xff]  ;;  %v2488_v60 = vor.u32 %v2645_v31, %v2485_v56  ;;  %v2428_v31 = vor.u32 %v2632_v54, %v2427_v30 }
 0x49f   :  { %v2648_v59 = vld [vmem:[%s3847_s7 + $0xb4] sm:$0xf0]  ;;  %v2429_v56 = vld [vmem:[%s3847_s7 + $0x38] sm:$0xf0] }
 0x4a0   :  { %v2492_v3 = vor.u32 %v2648_v59, %v2491_v57  ;;  %1924 = vmatpush.bf16.msra.mxu2 %v2488_v60  ;;  %v2432_v57 = vor.u32 %v2630_v23, %v2429_v56  ;;  %v2403_v59 = vld [vmem:[%s3847_s7] sm:$0xf]  ;;  %v2627_v60 = vld [vmem:[%s3847_s7 + $0xc] sm:$0xf0] }
 0x4a2   :  { %1943 = vmatpush.bf16.msra.mxu3 %v2492_v3  ;;  %v2625_v3 = vld [vmem:[%s3847_s7 + $0x4] sm:$0xf] }
 0x4ab   :  { %v2795_v2 = vpop.permute.xlu1 %2794 }
 0x4ac   :  { %v2797_v0 = vunpack.i.h.bf16 %v2795_v2  ;;  %v2796_v7 = vunpack.i.l.bf16 %v2795_v2  ;;  %v2646_v2 = vld [vmem:[%s3847_s7 + $0xac] sm:$0xf] }
 0x4ae   :  { %v1515_v12 = vsel %vm1512_vm4, %v1510_v38, %v2796_v7  ;;  %v1516_v46 = vsel %vm1512_vm4, %v1511_v45, %v2797_v0  ;;  %v2493_v0 = vld [vmem:[%s3847_s7 + $0xb8] sm:$0xf0]  ;;  %v2641_v45 = vld [vmem:[%s3847_s7 + $0x84] sm:$0xf] }
 0x4af   :  { %v1520_v13 = vsel %vm1517_vm13, %v1515_v12, %v2801_v11  ;;  %v1521_v35 = vsel %vm1517_vm13, %v1516_v46, %v2802_v36  ;;  %v2496_v7 = vor.u32 %v2646_v2, %v2493_v0  ;;  %v2467_v36 = vld [vmem:[%s3847_s7 + $0x80] sm:$0xf]  ;;  %v2643_v11 = vld [vmem:[%s3847_s7 + $0x8c] sm:$0xf0]  ;;  %v2469_v12 = vld [vmem:[%s3847_s7 + $0x90] sm:$0xf0]  ;;  %v2404_v2 = vor.u32 %v2627_v60, %v2403_v59 }
 0x4b0   :  { %v1539_v14 = vpack.c.bf16 %v1521_v35, %v1520_v13  ;;  %v2468_v38 = vor.u32 %v2643_v11, %v2467_v36  ;;  %v2475_v46 = vld [vmem:[%s3847_s7 + $0x88] sm:$0xf]  ;;  %v2644_v13 = vld [vmem:[%s3847_s7 + $0x94] sm:$0xf0]  ;;  %v2472_v35 = vor.u32 %v2641_v45, %v2469_v12  ;;  %v2405_v0 = vld [vmem:[%s3847_s7 + $0x10] sm:$0xf0] }
 0x4b1   :  { %1962 = vmatpush.bf16.msra.mxu0 %v2496_v7  ;;  %v2411_v7 = vld [vmem:[%s3847_s7 + $0x8] sm:$0xf]  ;;  %v2628_v36 = vld [vmem:[%s3847_s7 + $0x14] sm:$0xf0]  ;;  %v2408_v11 = vor.u32 %v2625_v3, %v2405_v0  ;;  %v2413_v12 = vld [vmem:[%s3847_s7 + $0x18] sm:$0xf0] }
 0x4b2   :  { %1601 = vmatmul.bf16.gmra.mxu0 %v1539_v14  ;;  %v2476_v14 = vor.u32 %v2644_v13, %v2475_v46  ;;  %1906 = vmatpush.bf16.msra.mxu1 %v2468_v38  ;;  %v2412_v45 = vor.u32 %v2628_v36, %v2411_v7  ;;  %v2626_v38 = vld [vmem:[%s3847_s7 + $0xc] sm:$0xf] }
 0x4b3   :  { %1925 = vmatpush.bf16.msra.mxu2 %v2472_v35  ;;  %v2416_v13 = vor.u32 %v2626_v38, %v2413_v12  ;;  %v1700_v38 = vrot.slane %v3263_v28, 3 }
 0x4b4   :  { %1944 = vmatpush.bf16.msra.mxu3 %v2476_v14 }
 0x517   :  { %v1597_v15 = vpop.f32.mrf.mxu0 }
 0x518   :  { %v3601_v9 = vadd.f32 %v2903_v41, %v1597_v15  ;;  %v2642_v15 = vld [vmem:[%s3847_s7 + $0x8c] sm:$0xf]  ;;  %v2477_v41 = vld [vmem:[%s3847_s7 + $0x98] sm:$0xf0] }
 0x51a   :  { %v1611_v39 = vmul.f32 %v3601_v9, %v3601_v9 }
 0x51c   :  { %1615 = vadd.xlane.f32.xlu0 %v1611_v39  ;;  %v2480_v39 = vor.u32 %v2642_v15, %v2477_v41 }
 0x51e   :  { %1963 = vmatpush.bf16.msra.mxu0 %v2480_v39 }
 0x51f   :  { %v1599_v17 = vpop.f32.mrf.mxu0 }
 0x520   :  { %v3608_v16 = vadd.f32 %v2904_v42, %v1599_v17  ;;  %v2451_v17 = vld [vmem:[%s3847_s7 + $0x60] sm:$0xf]  ;;  %v2639_v42 = vld [vmem:[%s3847_s7 + $0x6c] sm:$0xf0] }
 0x522   :  { %v1612_v8 = vmul.f32 %v3608_v16, %v3608_v16  ;;  %1964 = vmatpush.bf16.msra.mxu0 %v2464_v37 }
 0x524   :  { %1617 = vadd.xlane.f32.xlu2 %v1612_v8  ;;  %v2637_v8 = vld [vmem:[%s3847_s7 + $0x64] sm:$0xf] }
 0x526   :  { %1965 = vmatpush.bf16.msra.mxu0 %v2448_v43 }
 0x52a   :  { %1966 = vmatpush.bf16.msra.mxu0 %v2432_v57  ;;  %v1684_v57 = vrot.slane %v3263_v28, 2  ;;  %v2670_v28 = vld [vmem:[#allocation5 + $0x68] sm:$0xff] }
 0x52c   :  { %v1688_v0 = vadd.f32 1.0, %v1684_v57 }
 0x52e   :  { %1967 = vmatpush.bf16.msra.mxu0 %v2416_v13 }
 0x52f   :  { %v1602_v18 = vpop.f32.mrf.mxu0 }
 0x530   :  { %v3615_v55 = vadd.f32 %v2905_v49, %v1602_v18  ;;  %v2452_v18 = vor.u32 %v2639_v42, %v2451_v17  ;;  %v2453_v49 = vld [vmem:[%s3847_s7 + $0x70] sm:$0xf0] }
 0x532   :  { %v1613_v24 = vmul.f32 %v3615_v55, %v3615_v55  ;;  %1907 = vmatpush.bf16.msra.mxu1 %v2452_v18 }
 0x534   :  { %1619 = vadd.xlane.f32.xlu1 %v1613_v24  ;;  %v2459_v24 = vld [vmem:[%s3847_s7 + $0x68] sm:$0xf] }
 0x536   :  { %1908 = vmatpush.bf16.msra.mxu1 %v2436_v1 }
 0x537   :  { %v1604_v20 = vpop.f32.mrf.mxu0 }
 0x538   :  { %v3622_v63 = vadd.f32 %v2906_v21, %v1604_v20  ;;  %v2640_v20 = vld [vmem:[%s3847_s7 + $0x74] sm:$0xf0]  ;;  %v2456_v21 = vor.u32 %v2637_v8, %v2453_v49 }
 0x53a   :  { %v1614_v62 = vmul.f32 %v3622_v63, %v3622_v63  ;;  %1926 = vmatpush.bf16.msra.mxu2 %v2456_v21  ;;  %1909 = vmatpush.bf16.msra.mxu1 %v2420_v52 }
 0x53c   :  { %1621 = vadd.xlane.f32.xlu0 %v1614_v62  ;;  %v2460_v62 = vor.u32 %v2640_v20, %v2459_v24  ;;  %v1683_v24 = vrot.slane %v3251_v61, 2 }
 0x53e   :  { %1945 = vmatpush.bf16.msra.mxu3 %v2460_v62  ;;  %1927 = vmatpush.bf16.msra.mxu2 %v2440_v34  ;;  %v1687_v29 = vadd.f32 1.0, %v1683_v24  ;;  %v1699_v34 = vrot.slane %v3251_v61, 3  ;;  %v2669_v24 = vld [vmem:[#allocation5 + $0x60] sm:$0xff] }
 0x53f   :  { %1910 = vmatpush.bf16.msra.mxu1 %v2404_v2 }
 0x540   :  { %v1691_v33 = vperm.slane %v1687_v29, 0  ;;  %v1701_v4 = vperm.slane %v1699_v34, 0  ;;  %v2665_v29 = vld [vmem:[#allocation5 + $0x40] sm:$0xff] }
 0x542   :  { %1946 = vmatpush.bf16.msra.mxu3 %v2444_v10  ;;  %1928 = vmatpush.bf16.msra.mxu2 %v2424_v51 }
 0x546   :  { %1947 = vmatpush.bf16.msra.mxu3 %v2428_v31  ;;  %1929 = vmatpush.bf16.msra.mxu2 %v2408_v11 }
 0x54a   :  { %1948 = vmatpush.bf16.msra.mxu3 %v2412_v45  ;;  %v1692_v45 = vperm.slane %v1688_v0, 0 }
 0x58f   :  { %v1616_v50 = vpop.xlane.xlu0 %1615 }
 0x590   :  { %v1623_v22 = vmul.f32 %v1616_v50, %v3198_v6 }
 0x592   :  { %v1627_v58 = vadd.f32 1e-06, %v1623_v22 }
 0x594   :  { %2879 = vrsqrt.f32 %v1627_v58  ;;  %vm1637_vm14 = vweird.f32 %v1627_v58 }
 0x597   :  { %v1618_v46 = vpop.xlane.xlu2 %1617 }
 0x598   :  { %v1624_v35 = vmul.f32 %v1618_v46, %v3198_v6 }
 0x59a   :  { %v2880_v14 = vpop.eup %2879  ;;  %v1628_v15 = vadd.f32 1e-06, %v1624_v35 }
 0x59b   :  { %v1632_v41 = vmul.f32 %v2880_v14, %v1627_v58  ;;  %vm1638_vm3 = vweird.f32 %v2880_v14 }
 0x59c   :  { %2881 = vrsqrt.f32 %v1628_v15  ;;  %vm1639_vm15 = vmor %vm1637_vm14, %vm1638_vm3  ;;  %vm1647_vm1 = vweird.f32 %v1628_v15 }
 0x59d   :  { %v1633_v39 = vmul.f32 %v2880_v14, %v1632_v41 }
 0x59f   :  { %v1634_v17 = vmul.f32 0.5, %v1633_v39 }
 0x5a1   :  { %v1635_v42 = vsub.f32 1.5, %v1634_v17 }
 0x5a2   :  { %v2882_v8 = vpop.eup %2881 }
 0x5a3   :  { %v1636_v18 = vmul.f32 %v2880_v14, %v1635_v42  ;;  %v1642_v49 = vmul.f32 %v2882_v8, %v1628_v15  ;;  %vm1648_vm0 = vweird.f32 %v2882_v8  ;;  %v2672_v42 = vld [vmem:[#allocation5 + $0x78] sm:$0xff] }
 0x5a4   :  { %vm1649_vm2 = vmor %vm1647_vm1, %vm1648_vm0  ;;  %2210 = vmatpush.bf16.msrb.mxu2 %v2672_v42 }
 0x5a5   :  { %v1640_v20 = vsel %vm1639_vm15, %v2880_v14, %v1636_v18  ;;  %v1643_v21 = vmul.f32 %v2882_v8, %v1642_v49  ;;  %v1702_v14 = vperm.slane %v1700_v38, 0  ;;  %v2664_v18 = vld [vmem:[#allocation5 + $0x38] sm:$0xff]  ;;  %v2663_v49 = vld [vmem:[#allocation5 + $0x30] sm:$0xff] }
 0x5a6   :  { %v1671_v37 = vmul.f32 %v1640_v20, %v3601_v9  ;;  %2191 = vmatpush.bf16.msrb.mxu1 %v2664_v18  ;;  %v2662_v20 = vld [vmem:[#allocation5 + $0x28] sm:$0xff] }
 0x5a7   :  { %v1644_v62 = vmul.f32 0.5, %v1643_v21  ;;  %v1620_v26 = vpop.xlane.xlu1 %1619  ;;  %v2668_v21 = vld [vmem:[#allocation5 + $0x58] sm:$0xff] }
 0x5a8   :  { %v1625_v5 = vmul.f32 %v1620_v26, %v3198_v6  ;;  %v1679_v32 = vmul.f32 %v2804_v27, %v1671_v37  ;;  %v2667_v26 = vld [vmem:[#allocation5 + $0x50] sm:$0xff]  ;;  %v2666_v37 = vld [vmem:[#allocation5 + $0x48] sm:$0xff] }
 0x5a9   :  { %v1645_v25 = vsub.f32 1.5, %v1644_v62  ;;  %v2661_v62 = vld [vmem:[#allocation5 + $0x20] sm:$0xff] }
 0x5aa   :  { %v1629_v1 = vadd.f32 1e-06, %v1625_v5  ;;  %v1695_v22 = vmul.f32 %v1691_v33, %v1679_v32  ;;  %2192 = vmatpush.bf16.msrb.mxu1 %v2663_v49  ;;  %v2659_v5 = vld [vmem:[#allocation5 + $0x10] sm:$0xff] }
 0x5ab   :  { %v1646_v44 = vmul.f32 %v2882_v8, %v1645_v25 }
 0x5ac   :  { %2883 = vrsqrt.f32 %v1629_v1  ;;  %v1705_v30 = vadd.f32 %v1701_v4, %v1695_v22  ;;  %vm1657_vm6 = vweird.f32 %v1629_v1 }
 0x5ad   :  { %v1650_v10 = vsel %vm1649_vm2, %v2882_v8, %v1646_v44  ;;  %v2671_v8 = vld [vmem:[#allocation5 + $0x70] sm:$0xff] }
 0x5ae   :  { %v1672_v19 = vmul.f32 %v1650_v10, %v3608_v16  ;;  %2211 = vmatpush.bf16.msrb.mxu2 %v2671_v8  ;;  %2193 = vmatpush.bf16.msrb.mxu1 %v2662_v20 }
 0x5af   :  { %v1622_v40 = vpop.xlane.xlu0 %1621 }
 0x5b0   :  { %v1680_v50 = vmul.f32 %v2804_v27, %v1672_v19  ;;  %v1626_v43 = vmul.f32 %v1622_v40, %v3198_v6 }
 0x5b2   :  { %v2884_v47 = vpop.eup %2883  ;;  %v1630_v48 = vadd.f32 1e-06, %v1626_v43  ;;  %v1696_v52 = vmul.f32 %v1691_v33, %v1680_v50  ;;  %2212 = vmatpush.bf16.msrb.mxu2 %v2670_v28  ;;  %2194 = vmatpush.bf16.msrb.mxu1 %v2661_v62  ;;  %v2657_v33 = vld [vmem:[#allocation5] sm:$0xff] }
 0x5b3   :  { %v1652_v53 = vmul.f32 %v2884_v47, %v1629_v1  ;;  %vm1658_vm5 = vweird.f32 %v2884_v47  ;;  %v2658_v1 = vld [vmem:[#allocation5 + $0x8] sm:$0xff] }
 0x5b4   :  { %2885 = vrsqrt.f32 %v1630_v48  ;;  %v1706_v54 = vadd.f32 %v1701_v4, %v1696_v52  ;;  %vm1659_vm7 = vmor %vm1657_vm6, %vm1658_vm5  ;;  %vm1667_vm9 = vweird.f32 %v1630_v48 }
 0x5b5   :  { %v1653_v58 = vmul.f32 %v2884_v47, %v1652_v53 }
 0x5b6   :  { %v1741_v51 = vpack.c.bf16 %v1706_v54, %v1705_v30  ;;  %2213 = vmatpush.bf16.msrb.mxu2 %v2669_v24 }
 0x5b7   :  { %v1654_v31 = vmul.f32 0.5, %v1653_v58 }
 0x5b8   :  { %1911 = vmatmul.bf16.vlgmr.msra.gmra.mxu1 %v1741_v51  ;;  %1930 = vmatmul.bf16.vlgmr.msra.gmra.mxu2 %v1741_v51 }
 0x5b9   :  { %v1655_v61 = vsub.f32 1.5, %v1654_v31  ;;  %1949 = vmatmul.bf16.vlgmr.msra.gmra.mxu3 %v1741_v51  ;;  %1968 = vmatmul.bf16.vlgmr.msra.gmra.mxu0 %v1741_v51 }
 0x5ba   :  { %v2886_v23 = vpop.eup %2885  ;;  %2214 = vmatpush.bf16.msrb.mxu2 %v2668_v21 }
 0x5bb   :  { %v1656_v6 = vmul.f32 %v2884_v47, %v1655_v61  ;;  %v1662_v56 = vmul.f32 %v2886_v23, %v1630_v48  ;;  %vm1668_vm8 = vweird.f32 %v2886_v23 }
 0x5bc   :  { %vm1669_vm10 = vmor %vm1667_vm9, %vm1668_vm8 }
 0x5bd   :  { %v1660_v59 = vsel %vm1659_vm7, %v2884_v47, %v1656_v6  ;;  %v1663_v60 = vmul.f32 %v2886_v23, %v1662_v56 }
 0x5be   :  { %v1673_v2 = vmul.f32 %v1660_v59, %v3615_v55  ;;  %2215 = vmatpush.bf16.msrb.mxu2 %v2667_v26 }
 0x5bf   :  { %v1664_v3 = vmul.f32 0.5, %v1663_v60 }
 0x5c0   :  { %v1681_v11 = vmul.f32 %v2804_v27, %v1673_v2 }
 0x5c1   :  { %v1665_v7 = vsub.f32 1.5, %v1664_v3 }
 0x5c2   :  { %v1697_v35 = vmul.f32 %v1692_v45, %v1681_v11  ;;  %2216 = vmatpush.bf16.msrb.mxu2 %v2666_v37 }
 0x5c3   :  { %v1666_v36 = vmul.f32 %v2886_v23, %v1665_v7 }
 0x5c4   :  { %v1707_v41 = vadd.f32 %v1702_v14, %v1697_v35 }
 0x5c5   :  { %v1670_v12 = vsel %vm1669_vm10, %v2886_v23, %v1666_v36 }
 0x5c6   :  { %v1674_v46 = vmul.f32 %v1670_v12, %v3622_v63  ;;  %2217 = vmatpush.bf16.msrb.mxu2 %v2665_v29 }
 0x5c8   :  { %v1682_v13 = vmul.f32 %v2804_v27, %v1674_v46  ;;  %v2660_v27 = vld [vmem:[#allocation5 + $0x18] sm:$0xff] }
 0x5c9   :  { %2195 = vmatpush.bf16.msrb.mxu1 %v2660_v27 }
 0x5ca   :  { %v1698_v15 = vmul.f32 %v1692_v45, %v1682_v13 }
 0x5cc   :  { %v1708_v39 = vadd.f32 %v1702_v14, %v1698_v15 }
 0x5cd   :  { %2196 = vmatpush.bf16.msrb.mxu1 %v2659_v5 }
 0x5ce   :  { %v1742_v17 = vpack.c.bf16 %v1708_v39, %v1707_v41 }
 0x5d0   :  { %1916 = vmatmul.bf16.gmra.mxu1 %v1742_v17  ;;  %1935 = vmatmul.bf16.gmra.mxu2 %v1742_v17 }
 0x5d1   :  { %1954 = vmatmul.bf16.gmra.mxu3 %v1742_v17  ;;  %1973 = vmatmul.bf16.gmra.mxu0 %v1742_v17 }
 0x5d2   :  { %2197 = vmatpush.bf16.msrb.mxu1 %v2658_v1 }
 0x5d6   :  { %2198 = vmatpush.bf16.msrb.mxu1 %v2657_v33 }
 0x635   :  { %v1912_v36 = vpop.f32.mrf.mxu1 }
 0x636   :  { %v1969_v25 = vpop.f32.mrf.mxu0 }
 0x637   :  { %v1988_v44 = vmul.f32 0.044715, %v1969_v25  ;;  %v1980_v2 = vmul.f32 0.5, %v1969_v25 }
 0x639   :  { %v1996_v32 = vmul.f32 %v1988_v44, %v1969_v25 }
 0x63b   :  { %v2004_v34 = vmul.f32 %v1996_v32, %v1969_v25  ;;  %v1931_v6 = vpop.f32.mrf.mxu2 }
 0x63c   :  { %v1950_v10 = vpop.f32.mrf.mxu3 }
 0x63d   :  { %v2012_v19 = vadd.f32 %v2004_v34, %v1969_v25  ;;  %v1987_v40 = vmul.f32 0.044715, %v1950_v10  ;;  %v1979_v39 = vmul.f32 0.5, %v1950_v10  ;;  %v1914_v29 = vpop.f32.mrf.mxu1 }
 0x63e   :  { %v1971_v50 = vpop.f32.mrf.mxu0 }
 0x63f   :  { %v2020_v43 = vmul.f32 0.7978846, %v2012_v19  ;;  %v1995_v22 = vmul.f32 %v1987_v40, %v1950_v10  ;;  %v1990_v4 = vmul.f32 0.044715, %v1971_v50  ;;  %v1982_v38 = vmul.f32 0.5, %v1971_v50 }
 0x641   :  { %v2003_v47 = vmul.f32 %v1995_v22, %v1950_v10  ;;  %v1998_v48 = vmul.f32 %v1990_v4, %v1971_v50  ;;  %2887 = vtanh.f32 %v2020_v43 }
 0x643   :  { %v2011_v52 = vadd.f32 %v2003_v47, %v1950_v10  ;;  %v2006_v53 = vmul.f32 %v1998_v48, %v1971_v50  ;;  %v1933_v14 = vpop.f32.mrf.mxu2 }
 0x644   :  { %v1952_v30 = vpop.f32.mrf.mxu3 }
 0x645   :  { %v2019_v54 = vmul.f32 0.7978846, %v2011_v52  ;;  %v2014_v58 = vadd.f32 %v2006_v53, %v1971_v50  ;;  %v1989_v51 = vmul.f32 0.044715, %v1952_v30  ;;  %v1981_v20 = vmul.f32 0.5, %v1952_v30 }
 0x647   :  { %v2022_v31 = vmul.f32 0.7978846, %v2014_v58  ;;  %v1997_v61 = vmul.f32 %v1989_v51, %v1952_v30  ;;  %2889 = vtanh.f32 %v2019_v54  ;;  %v2888_v23 = vpop.eup %2887 }
 0x648   :  { %v2036_v59 = vadd.f32 1.0, %v2888_v23 }
 0x649   :  { %2891 = vtanh.f32 %v2022_v31  ;;  %v2005_v56 = vmul.f32 %v1997_v61, %v1952_v30 }
 0x64a   :  { %v2044_v45 = vmul.f32 %v2036_v59, %v1980_v2 }
 0x64b   :  { %v2013_v57 = vadd.f32 %v2005_v56, %v1952_v30 }
 0x64c   :  { %v2052_v41 = vmul.f32 %v2044_v45, %v1931_v6 }
 0x64d   :  { %v2021_v60 = vmul.f32 0.7978846, %v2013_v57  ;;  %v2890_v3 = vpop.eup %2889  ;;  %v1917_v61 = vpop.f32.mrf.mxu1 }
 0x64e   :  { %v1974_v0 = vpop.f32.mrf.mxu0  ;;  %v2035_v13 = vadd.f32 1.0, %v2890_v3 }
 0x64f   :  { %v2892_v7 = vpop.eup %2891  ;;  %2893 = vtanh.f32 %v2021_v60  ;;  %v1992_v11 = vmul.f32 0.044715, %v1974_v0  ;;  %v1984_v51 = vmul.f32 0.5, %v1974_v0 }
 0x650   :  { %v2038_v12 = vadd.f32 1.0, %v2892_v7  ;;  %v2043_v49 = vmul.f32 %v2035_v13, %v1979_v39 }
 0x651   :  { %v2000_v46 = vmul.f32 %v1992_v11, %v1974_v0 }
 0x652   :  { %v2046_v35 = vmul.f32 %v2038_v12, %v1982_v38  ;;  %v2051_v44 = vmul.f32 %v2043_v49, %v1912_v36 }
 0x653   :  { %v2008_v15 = vmul.f32 %v2000_v46, %v1974_v0  ;;  %v1936_v48 = vpop.f32.mrf.mxu2 }
 0x654   :  { %v2054_v17 = vmul.f32 %v2046_v35, %v1933_v14  ;;  %v1955_v42 = vpop.f32.mrf.mxu3 }
 0x655   :  { %v2894_v8 = vpop.eup %2893  ;;  %v2016_v18 = vadd.f32 %v2008_v15, %v1974_v0  ;;  %v1991_v28 = vmul.f32 0.044715, %v1955_v42  ;;  %v1983_v7 = vmul.f32 0.5, %v1955_v42  ;;  %v1919_v0 = vpop.f32.mrf.mxu1 }
 0x656   :  { %v2092_v24 = vpack.c.bf16 %v2054_v17, %v2052_v41  ;;  %v2037_v21 = vadd.f32 1.0, %v2894_v8  ;;  %v1976_v62 = vpop.f32.mrf.mxu0 }
 0x657   :  { %v2024_v26 = vmul.f32 0.7978846, %v2016_v18  ;;  %v1999_v27 = vmul.f32 %v1991_v28, %v1955_v42  ;;  %v1994_v37 = vmul.f32 0.044715, %v1976_v62  ;;  %v1986_v6 = vmul.f32 0.5, %v1976_v62 }
 0x658   :  { %v2045_v5 = vmul.f32 %v2037_v21, %v1981_v20  ;;  %2218 = vmatmul.bf16.vlgmr.msrb.gmra.mxu2 %v2092_v24 }
 0x659   :  { %v2007_v25 = vmul.f32 %v1999_v27, %v1955_v42  ;;  %v2002_v1 = vmul.f32 %v1994_v37, %v1976_v62  ;;  %2895 = vtanh.f32 %v2024_v26 }
 0x65a   :  { %v2053_v32 = vmul.f32 %v2045_v5, %v1914_v29 }
 0x65b   :  { %v2015_v33 = vadd.f32 %v2007_v25, %v1955_v42  ;;  %v2010_v34 = vmul.f32 %v2002_v1, %v1976_v62  ;;  %v1938_v60 = vpop.f32.mrf.mxu2 }
 0x65c   :  { %v1957_v10 = vpop.f32.mrf.mxu3  ;;  %v2091_v19 = vpack.c.bf16 %v2053_v32, %v2051_v44 }
 0x65d   :  { %v2023_v40 = vmul.f32 0.7978846, %v2015_v33  ;;  %v2018_v50 = vadd.f32 %v2010_v34, %v1976_v62  ;;  %v1993_v43 = vmul.f32 0.044715, %v1957_v10  ;;  %v1985_v11 = vmul.f32 0.5, %v1957_v10 }
 0x65e   :  { %2199 = vmatmul.bf16.vlgmr.msrb.gmra.mxu1 %v2091_v19 }
 0x65f   :  { %v2026_v22 = vmul.f32 0.7978846, %v2018_v50  ;;  %v2001_v4 = vmul.f32 %v1993_v43, %v1957_v10  ;;  %2897 = vtanh.f32 %v2023_v40  ;;  %v2896_v47 = vpop.eup %2895 }
 0x660   :  { %v2040_v30 = vadd.f32 1.0, %v2896_v47 }
 0x661   :  { %2899 = vtanh.f32 %v2026_v22  ;;  %v2009_v52 = vmul.f32 %v2001_v4, %v1957_v10 }
 0x662   :  { %v2048_v23 = vmul.f32 %v2040_v30, %v1984_v51 }
 0x663   :  { %v2017_v53 = vadd.f32 %v2009_v52, %v1957_v10 }
 0x664   :  { %v2056_v3 = vmul.f32 %v2048_v23, %v1936_v48 }
 0x665   :  { %v2025_v54 = vmul.f32 0.7978846, %v2017_v53  ;;  %v2898_v58 = vpop.eup %2897 }
 0x666   :  { %v2039_v59 = vadd.f32 1.0, %v2898_v58 }
 0x667   :  { %v2900_v31 = vpop.eup %2899  ;;  %2901 = vtanh.f32 %v2025_v54 }
 0x668   :  { %v2042_v56 = vadd.f32 1.0, %v2900_v31  ;;  %v2047_v12 = vmul.f32 %v2039_v59, %v1983_v7 }
 0x66a   :  { %v2050_v57 = vmul.f32 %v2042_v56, %v1986_v6  ;;  %v2055_v13 = vmul.f32 %v2047_v12, %v1917_v61 }
 0x66c   :  { %v2058_v2 = vmul.f32 %v2050_v57, %v1938_v60 }
 0x66d   :  { %v2902_v36 = vpop.eup %2901 }
 0x66e   :  { %v2094_v45 = vpack.c.bf16 %v2058_v2, %v2056_v3  ;;  %v2041_v38 = vadd.f32 1.0, %v2902_v36 }
 0x670   :  { %2223 = vmatmul.bf16.gmra.mxu2 %v2094_v45  ;;  %v2049_v46 = vmul.f32 %v2041_v38, %v1985_v11 }
 0x672   :  { %v2057_v35 = vmul.f32 %v2049_v46, %v1919_v0 }
 0x674   :  { %v2093_v14 = vpack.c.bf16 %v2057_v35, %v2055_v13 }
 0x676   :  { %2204 = vmatmul.bf16.gmra.mxu1 %v2093_v14 }
 0x6db   :  { %v2200_v15 = vpop.f32.mrf.mxu1  ;;  %v2219_v41 = vpop.f32.mrf.mxu2 }
 0x6dc   :  { %v2220_v39 = vadd.f32 %v2219_v41, %v2200_v15 }
 0x6de   :  { %v2229_v17 = vadd.f32 %v2220_v39, %v3601_v9 }
 0x6e0   :  { %2233 = vst [vmem:[#allocation7] sm:$0xff] %v2229_v17 }
 0x6e3   :  { %v2202_v8 = vpop.f32.mrf.mxu1  ;;  %v2221_v42 = vpop.f32.mrf.mxu2 }
 0x6e4   :  { %v2222_v18 = vadd.f32 %v2221_v42, %v2202_v8 }
 0x6e6   :  { %v2230_v28 = vadd.f32 %v2222_v18, %v3608_v16 }
 0x6e8   :  { %2234 = vst [vmem:[#allocation7 + $0x8] sm:$0xff] %v2230_v28 }
 0x6f3   :  { %v2205_v49 = vpop.f32.mrf.mxu1  ;;  %v2224_v24 = vpop.f32.mrf.mxu2 }
 0x6f4   :  { %v2225_v20 = vadd.f32 %v2224_v24, %v2205_v49 }
 0x6f6   :  { %v2231_v21 = vadd.f32 %v2225_v20, %v3615_v55 }
 0x6f8   :  { %2235 = vst [vmem:[#allocation7 + $0x10] sm:$0xff] %v2231_v21 }
 0x6fb   :  { %v2207_v9 = vpop.f32.mrf.mxu1  ;;  %v2226_v62 = vpop.f32.mrf.mxu2 }
 0x6fc   :  { %v2227_v26 = vadd.f32 %v2226_v62, %v2207_v9 }
 0x6fe   :  { %v2232_v16 = vadd.f32 %v2227_v26, %v3622_v63 }
 0x700   :  { %2236 = vst [vmem:[#allocation7 + $0x18] sm:$0xff] %v2232_v16 }
 0x701   :  { %2249 = dma.vmem_to_hbm [thread:$0]  %s2242_s22, 512, %s2244_s1, [#allocation4], %s2993_s17, %s2993_s17, %s2994_s3  }
 0x702   :  { %2983 = dma.done.wait [#allocation4], 512  }
 0x703   :  { %2984 = vsyncadd [#allocation4], 4294966784 }
 0x704   :  { %2254 = vsyncpa [#allocation3], 1 }
 0x705   :  { %2255 = vsyncpa [#allocation6], 1 }
 0x706   :  { %2256 = vsyncpa [#allocation4], 1 }

</bundles_post_ra>
